<compile_context>
chip_gen: v5e
topology: v5e:2x2
jax: 0.10.0
libtpu: 0.0.40
codegen_flags: <defaults>
</compile_context>

<pallas_src>
import functools

import jax
import jax.numpy as jnp
import numpy as np
from jax import lax
from jax.experimental import pallas as pl
from jax.experimental.pallas import tpu as pltpu

_PREC = lax.Precision.HIGHEST   # full-f32 MXU passes; matched in the reference
_LANES = 128


def _seq_disc_kernel(x_ref, w_ih_ref, w_hh_ref, b_ref, w_clf_ref, b_clf_ref,
                     pred_ref, *, hidden_dim, seq_len):
    """Phase 1: gates_x = x @ w_ih + b for all timesteps (one MXU matmul).
       Phase 2: serial LSTM recurrence, h/c in vregs, full-width activations.
       Phase 3: pred = H_hist @ w_clf + b_clf (one matmul, lane-dense store)."""
    H = hidden_dim
    G = 4 * H                                            # gate width, order i,f,g,o

    # ---- Phase 1: hoisted input projection for ALL timesteps ---------------
    gx = jnp.dot(x_ref[...], w_ih_ref[...],
                 preferred_element_type=jnp.float32, precision=_PREC)
    gx = gx + b_ref[...]                                 # (seq_len, 4H), in vregs

    # Loop-invariant lane mask selecting the g-gate lanes [2H, 3H)  (hoisted:
    # broadcast_in_dim is not CSE'd by JAX, so never build it inside the loop).
    lane = lax.broadcasted_iota(jnp.int32, (1, G), 1)
    g_lane = (lane >= 2 * H) & (lane < 3 * H)

    # ---- Phase 2: serial recurrence (h, c carried in registers) ------------
    h = jnp.zeros((1, H), jnp.float32)                   # PyTorch init_hidden
    c = jnp.zeros((1, H), jnp.float32)
    hs = []
    for t in range(seq_len):                             # static full unroll
        gates = gx[t:t + 1, :] + jnp.dot(
            h, w_hh_ref[...],
            preferred_element_type=jnp.float32, precision=_PREC)   # (1, 4H)
        # Two full-128-lane EUP passes instead of four 32-lane ones.
        # sigmoid(x) == 0.5 * tanh(0.5 * x) + 0.5  (exact identity).
        tanh_all = jnp.tanh(gates)
        sig_all = 0.5 * jnp.tanh(0.5 * gates) + 0.5
        act = jnp.where(g_lane, tanh_all, sig_all)       # [sig(i) sig(f) tanh(g) sig(o)]
        i_g = act[:, 0 * H:1 * H]
        f_g = act[:, 1 * H:2 * H]
        g_g = act[:, 2 * H:3 * H]
        o_g = act[:, 3 * H:4 * H]
        c = f_g * c + i_g * g_g
        h = o_g * jnp.tanh(c)
        hs.append(h)                                     # stays in vregs

    # ---- Phase 3: classifier head once, after the recurrence ---------------
    h_hist = jnp.concatenate(hs, axis=0)                 # (seq_len, H), in vregs
    pred_ref[...] = jnp.dot(h_hist, w_clf_ref[...],
                            preferred_element_type=jnp.float32,
                            precision=_PREC) + b_clf_ref[...]


def seq_discriminator_forward(x, w_ih, w_hh, b_ih, b_hh, w_clf, b_clf,
                              hidden_dim):
    """x: (seq_len, input_dim) -> pred: (seq_len, output_dim), float32."""
    seq_len, input_dim = x.shape
    output_dim = w_clf.shape[0]
    out_pad = max(_LANES, ((output_dim + _LANES - 1) // _LANES) * _LANES)

    # Plain-JAX weight plumbing: transpose to row-vector @ matrix layout, fold
    # the two LSTM biases, zero-pad the classifier to a full 128-lane tile so
    # the kernel's only HBM store is lane-dense.
    w_ih_t = jnp.asarray(w_ih, jnp.float32).T                      # (in, 4H)
    w_hh_t = jnp.asarray(w_hh, jnp.float32).T                      # (H, 4H)
    b = (jnp.asarray(b_ih, jnp.float32)
         + jnp.asarray(b_hh, jnp.float32)).reshape(1, -1)          # (1, 4H)
    w_clf_p = jnp.zeros((hidden_dim, out_pad), jnp.float32)
    w_clf_p = w_clf_p.at[:, :output_dim].set(jnp.asarray(w_clf, jnp.float32).T)
    b_clf_p = jnp.zeros((1, out_pad), jnp.float32)
    b_clf_p = b_clf_p.at[:, :output_dim].set(jnp.asarray(b_clf, jnp.float32))

    kernel = functools.partial(_seq_disc_kernel,
                               hidden_dim=hidden_dim, seq_len=seq_len)
    vmem = pl.BlockSpec(memory_space=pltpu.MemorySpace.VMEM)

    pred_padded = pl.pallas_call(
        kernel,
        out_shape=jax.ShapeDtypeStruct((seq_len, out_pad), jnp.float32),
        in_specs=[vmem] * 6,
        out_specs=vmem,
    )(jnp.asarray(x, jnp.float32), w_ih_t, w_hh_t, b, w_clf_p, b_clf_p)
    return pred_padded[:, :output_dim]


def _reference_forward(x, w_ih, w_hh, b_ih, b_hh, w_clf, b_clf, hidden_dim):
    """Pure-JAX reference matching torch.nn.LSTM + nn.Linear semantics."""
    H = hidden_dim

    def cell(carry, x_t):
        h, c = carry
        gates = (jnp.dot(x_t, w_ih.T, precision=_PREC) + b_ih
                 + jnp.dot(h, w_hh.T, precision=_PREC) + b_hh)
        i = jax.nn.sigmoid(gates[0 * H:1 * H])
        f = jax.nn.sigmoid(gates[1 * H:2 * H])
        g = jnp.tanh(gates[2 * H:3 * H])
        o = jax.nn.sigmoid(gates[3 * H:4 * H])
        c_new = f * c + i * g
        h_new = o * jnp.tanh(c_new)
        return (h_new, c_new), h_new

    h0 = jnp.zeros((H,), jnp.float32)
    c0 = jnp.zeros((H,), jnp.float32)
    _, hs = lax.scan(cell, (h0, c0), x)
    return jnp.dot(hs, w_clf.T, precision=_PREC) + b_clf


if __name__ == "__main__":
    seq_len, input_dim, hidden_dim, output_dim = 8, 16, 32, 4

    key = jax.random.PRNGKey(0)
    ks = jax.random.split(key, 7)
    # deterministic PyTorch-style uniform(-1/sqrt(H), 1/sqrt(H)) init
    s = 1.0 / np.sqrt(hidden_dim)
    w_ih = jax.random.uniform(ks[0], (4 * hidden_dim, input_dim), jnp.float32, -s, s)
    w_hh = jax.random.uniform(ks[1], (4 * hidden_dim, hidden_dim), jnp.float32, -s, s)
    b_ih = jax.random.uniform(ks[2], (4 * hidden_dim,), jnp.float32, -s, s)
    b_hh = jax.random.uniform(ks[3], (4 * hidden_dim,), jnp.float32, -s, s)
    w_clf = jax.random.uniform(ks[4], (output_dim, hidden_dim), jnp.float32, -s, s)
    b_clf = jax.random.uniform(ks[5], (output_dim,), jnp.float32, -s, s)

    x = jax.random.normal(ks[6], (seq_len, input_dim), jnp.float32)

    pred = seq_discriminator_forward(x, w_ih, w_hh, b_ih, b_hh, w_clf, b_clf,
                                     hidden_dim)
    pred = jax.block_until_ready(pred)

    ref = _reference_forward(x, w_ih, w_hh, b_ih, b_hh, w_clf, b_clf, hidden_dim)
    ref = jax.block_until_ready(ref)

    assert pred.shape == (seq_len, output_dim)
    np.testing.assert_allclose(np.asarray(pred), np.asarray(ref),
                               rtol=1e-5, atol=1e-5)
    print("KERNEL_OK")
</pallas_src>

<mosaic_0001>
module attributes {stable_mosaic.version = 11 : i64} {
  func.func @_seq_disc_kernel(%arg0: memref<8x16xf32, #tpu.memory_space<vmem>>, %arg1: memref<16x128xf32, #tpu.memory_space<vmem>>, %arg2: memref<32x128xf32, #tpu.memory_space<vmem>>, %arg3: memref<1x128xf32, #tpu.memory_space<vmem>>, %arg4: memref<32x128xf32, #tpu.memory_space<vmem>>, %arg5: memref<1x128xf32, #tpu.memory_space<vmem>>, %arg6: memref<8x128xf32, #tpu.memory_space<vmem>>) attributes {dimension_semantics = [], scalar_prefetch = 0 : i64, scratch_operands = 0 : i64, tpu.core_type = #tpu.core_type<tc>} {
    %c0 = arith.constant 0 : index
    %c0_0 = arith.constant 0 : index
    %0 = vector.load %arg0[%c0, %c0_0] : memref<8x16xf32, #tpu.memory_space<vmem>>, vector<8x16xf32>
    %c0_1 = arith.constant 0 : index
    %c0_2 = arith.constant 0 : index
    %1 = vector.load %arg1[%c0_1, %c0_2] : memref<16x128xf32, #tpu.memory_space<vmem>>, vector<16x128xf32>
    %cst = arith.constant dense<0.000000e+00> : vector<8x128xf32>
    %2 = tpu.matmul %0, %1, %cst {dimension_numbers = #tpu.dot_dimension_numbers<[1], [0], [0], [1], [0, 0, 1, 1], [], []>, precision = #tpu.contract_precision<fp32>} : vector<8x16xf32>, vector<16x128xf32>, vector<8x128xf32> -> vector<8x128xf32>
    %c0_3 = arith.constant 0 : index
    %c0_4 = arith.constant 0 : index
    %3 = vector.load %arg3[%c0_3, %c0_4] : memref<1x128xf32, #tpu.memory_space<vmem>>, vector<1x128xf32>
    %4 = vector.broadcast %3 : vector<1x128xf32> to vector<8x128xf32>
    %5 = arith.addf %2, %4 : vector<8x128xf32>
    %6 = tpu.iota {dimensions = array<i32: 1>} : vector<1x128xi32>
    %c64_i32 = arith.constant 64 : i32
    %7 = vector.broadcast %c64_i32 : i32 to vector<1x128xi32>
    %8 = arith.cmpi sge, %6, %7 : vector<1x128xi32>
    %c96_i32 = arith.constant 96 : i32
    %9 = vector.broadcast %c96_i32 : i32 to vector<1x128xi32>
    %10 = arith.cmpi slt, %6, %9 : vector<1x128xi32>
    %11 = arith.andi %8, %10 : vector<1x128xi1>
    %cst_5 = arith.constant 0.000000e+00 : f32
    %12 = vector.broadcast %cst_5 : f32 to vector<1x32xf32>
    %cst_6 = arith.constant 0.000000e+00 : f32
    %13 = vector.broadcast %cst_6 : f32 to vector<1x32xf32>
    %14 = vector.extract_strided_slice %5 {offsets = [0, 0], sizes = [1, 128], strides = [1, 1]} : vector<8x128xf32> to vector<1x128xf32>
    %c0_7 = arith.constant 0 : index
    %c0_8 = arith.constant 0 : index
    %15 = vector.load %arg2[%c0_7, %c0_8] : memref<32x128xf32, #tpu.memory_space<vmem>>, vector<32x128xf32>
    %cst_9 = arith.constant dense<0.000000e+00> : vector<1x128xf32>
    %16 = tpu.matmul %12, %15, %cst_9 {dimension_numbers = #tpu.dot_dimension_numbers<[1], [0], [0], [1], [0, 0, 1, 1], [], []>, precision = #tpu.contract_precision<fp32>} : vector<1x32xf32>, vector<32x128xf32>, vector<1x128xf32> -> vector<1x128xf32>
    %17 = arith.addf %14, %16 : vector<1x128xf32>
    %18 = math.tanh %17 : vector<1x128xf32>
    %cst_10 = arith.constant 5.000000e-01 : f32
    %19 = vector.broadcast %cst_10 : f32 to vector<1x128xf32>
    %20 = arith.mulf %19, %17 : vector<1x128xf32>
    %21 = math.tanh %20 : vector<1x128xf32>
    %cst_11 = arith.constant 5.000000e-01 : f32
    %22 = vector.broadcast %cst_11 : f32 to vector<1x128xf32>
    %23 = arith.mulf %22, %21 : vector<1x128xf32>
    %cst_12 = arith.constant 5.000000e-01 : f32
    %24 = vector.broadcast %cst_12 : f32 to vector<1x128xf32>
    %25 = arith.addf %23, %24 : vector<1x128xf32>
    %26 = arith.select %11, %18, %25 : vector<1x128xi1>, vector<1x128xf32>
    %27 = vector.extract_strided_slice %26 {offsets = [0, 0], sizes = [1, 32], strides = [1, 1]} : vector<1x128xf32> to vector<1x32xf32>
    %28 = vector.extract_strided_slice %26 {offsets = [0, 32], sizes = [1, 32], strides = [1, 1]} : vector<1x128xf32> to vector<1x32xf32>
    %29 = vector.extract_strided_slice %26 {offsets = [0, 64], sizes = [1, 32], strides = [1, 1]} : vector<1x128xf32> to vector<1x32xf32>
    %30 = vector.extract_strided_slice %26 {offsets = [0, 96], sizes = [1, 32], strides = [1, 1]} : vector<1x128xf32> to vector<1x32xf32>
    %31 = arith.mulf %28, %13 : vector<1x32xf32>
    %32 = arith.mulf %27, %29 : vector<1x32xf32>
    %33 = arith.addf %31, %32 : vector<1x32xf32>
    %34 = math.tanh %33 : vector<1x32xf32>
    %35 = arith.mulf %30, %34 : vector<1x32xf32>
    %36 = vector.extract_strided_slice %5 {offsets = [1, 0], sizes = [1, 128], strides = [1, 1]} : vector<8x128xf32> to vector<1x128xf32>
    %c0_13 = arith.constant 0 : index
    %c0_14 = arith.constant 0 : index
    %37 = vector.load %arg2[%c0_13, %c0_14] : memref<32x128xf32, #tpu.memory_space<vmem>>, vector<32x128xf32>
    %cst_15 = arith.constant dense<0.000000e+00> : vector<1x128xf32>
    %38 = tpu.matmul %35, %37, %cst_15 {dimension_numbers = #tpu.dot_dimension_numbers<[1], [0], [0], [1], [0, 0, 1, 1], [], []>, precision = #tpu.contract_precision<fp32>} : vector<1x32xf32>, vector<32x128xf32>, vector<1x128xf32> -> vector<1x128xf32>
    %39 = arith.addf %36, %38 : vector<1x128xf32>
    %40 = math.tanh %39 : vector<1x128xf32>
    %cst_16 = arith.constant 5.000000e-01 : f32
    %41 = vector.broadcast %cst_16 : f32 to vector<1x128xf32>
    %42 = arith.mulf %41, %39 : vector<1x128xf32>
    %43 = math.tanh %42 : vector<1x128xf32>
    %cst_17 = arith.constant 5.000000e-01 : f32
    %44 = vector.broadcast %cst_17 : f32 to vector<1x128xf32>
    %45 = arith.mulf %44, %43 : vector<1x128xf32>
    %cst_18 = arith.constant 5.000000e-01 : f32
    %46 = vector.broadcast %cst_18 : f32 to vector<1x128xf32>
    %47 = arith.addf %45, %46 : vector<1x128xf32>
    %48 = arith.select %11, %40, %47 : vector<1x128xi1>, vector<1x128xf32>
    %49 = vector.extract_strided_slice %48 {offsets = [0, 0], sizes = [1, 32], strides = [1, 1]} : vector<1x128xf32> to vector<1x32xf32>
    %50 = vector.extract_strided_slice %48 {offsets = [0, 32], sizes = [1, 32], strides = [1, 1]} : vector<1x128xf32> to vector<1x32xf32>
    %51 = vector.extract_strided_slice %48 {offsets = [0, 64], sizes = [1, 32], strides = [1, 1]} : vector<1x128xf32> to vector<1x32xf32>
    %52 = vector.extract_strided_slice %48 {offsets = [0, 96], sizes = [1, 32], strides = [1, 1]} : vector<1x128xf32> to vector<1x32xf32>
    %53 = arith.mulf %50, %33 : vector<1x32xf32>
    %54 = arith.mulf %49, %51 : vector<1x32xf32>
    %55 = arith.addf %53, %54 : vector<1x32xf32>
    %56 = math.tanh %55 : vector<1x32xf32>
    %57 = arith.mulf %52, %56 : vector<1x32xf32>
    %58 = vector.extract_strided_slice %5 {offsets = [2, 0], sizes = [1, 128], strides = [1, 1]} : vector<8x128xf32> to vector<1x128xf32>
    %c0_19 = arith.constant 0 : index
    %c0_20 = arith.constant 0 : index
    %59 = vector.load %arg2[%c0_19, %c0_20] : memref<32x128xf32, #tpu.memory_space<vmem>>, vector<32x128xf32>
    %cst_21 = arith.constant dense<0.000000e+00> : vector<1x128xf32>
    %60 = tpu.matmul %57, %59, %cst_21 {dimension_numbers = #tpu.dot_dimension_numbers<[1], [0], [0], [1], [0, 0, 1, 1], [], []>, precision = #tpu.contract_precision<fp32>} : vector<1x32xf32>, vector<32x128xf32>, vector<1x128xf32> -> vector<1x128xf32>
    %61 = arith.addf %58, %60 : vector<1x128xf32>
    %62 = math.tanh %61 : vector<1x128xf32>
    %cst_22 = arith.constant 5.000000e-01 : f32
    %63 = vector.broadcast %cst_22 : f32 to vector<1x128xf32>
    %64 = arith.mulf %63, %61 : vector<1x128xf32>
    %65 = math.tanh %64 : vector<1x128xf32>
    %cst_23 = arith.constant 5.000000e-01 : f32
    %66 = vector.broadcast %cst_23 : f32 to vector<1x128xf32>
    %67 = arith.mulf %66, %65 : vector<1x128xf32>
    %cst_24 = arith.constant 5.000000e-01 : f32
    %68 = vector.broadcast %cst_24 : f32 to vector<1x128xf32>
    %69 = arith.addf %67, %68 : vector<1x128xf32>
    %70 = arith.select %11, %62, %69 : vector<1x128xi1>, vector<1x128xf32>
    %71 = vector.extract_strided_slice %70 {offsets = [0, 0], sizes = [1, 32], strides = [1, 1]} : vector<1x128xf32> to vector<1x32xf32>
    %72 = vector.extract_strided_slice %70 {offsets = [0, 32], sizes = [1, 32], strides = [1, 1]} : vector<1x128xf32> to vector<1x32xf32>
    %73 = vector.extract_strided_slice %70 {offsets = [0, 64], sizes = [1, 32], strides = [1, 1]} : vector<1x128xf32> to vector<1x32xf32>
    %74 = vector.extract_strided_slice %70 {offsets = [0, 96], sizes = [1, 32], strides = [1, 1]} : vector<1x128xf32> to vector<1x32xf32>
    %75 = arith.mulf %72, %55 : vector<1x32xf32>
    %76 = arith.mulf %71, %73 : vector<1x32xf32>
    %77 = arith.addf %75, %76 : vector<1x32xf32>
    %78 = math.tanh %77 : vector<1x32xf32>
    %79 = arith.mulf %74, %78 : vector<1x32xf32>
    %80 = vector.extract_strided_slice %5 {offsets = [3, 0], sizes = [1, 128], strides = [1, 1]} : vector<8x128xf32> to vector<1x128xf32>
    %c0_25 = arith.constant 0 : index
    %c0_26 = arith.constant 0 : index
    %81 = vector.load %arg2[%c0_25, %c0_26] : memref<32x128xf32, #tpu.memory_space<vmem>>, vector<32x128xf32>
    %cst_27 = arith.constant dense<0.000000e+00> : vector<1x128xf32>
    %82 = tpu.matmul %79, %81, %cst_27 {dimension_numbers = #tpu.dot_dimension_numbers<[1], [0], [0], [1], [0, 0, 1, 1], [], []>, precision = #tpu.contract_precision<fp32>} : vector<1x32xf32>, vector<32x128xf32>, vector<1x128xf32> -> vector<1x128xf32>
    %83 = arith.addf %80, %82 : vector<1x128xf32>
    %84 = math.tanh %83 : vector<1x128xf32>
    %cst_28 = arith.constant 5.000000e-01 : f32
    %85 = vector.broadcast %cst_28 : f32 to vector<1x128xf32>
    %86 = arith.mulf %85, %83 : vector<1x128xf32>
    %87 = math.tanh %86 : vector<1x128xf32>
    %cst_29 = arith.constant 5.000000e-01 : f32
    %88 = vector.broadcast %cst_29 : f32 to vector<1x128xf32>
    %89 = arith.mulf %88, %87 : vector<1x128xf32>
    %cst_30 = arith.constant 5.000000e-01 : f32
    %90 = vector.broadcast %cst_30 : f32 to vector<1x128xf32>
    %91 = arith.addf %89, %90 : vector<1x128xf32>
    %92 = arith.select %11, %84, %91 : vector<1x128xi1>, vector<1x128xf32>
    %93 = vector.extract_strided_slice %92 {offsets = [0, 0], sizes = [1, 32], strides = [1, 1]} : vector<1x128xf32> to vector<1x32xf32>
    %94 = vector.extract_strided_slice %92 {offsets = [0, 32], sizes = [1, 32], strides = [1, 1]} : vector<1x128xf32> to vector<1x32xf32>
    %95 = vector.extract_strided_slice %92 {offsets = [0, 64], sizes = [1, 32], strides = [1, 1]} : vector<1x128xf32> to vector<1x32xf32>
    %96 = vector.extract_strided_slice %92 {offsets = [0, 96], sizes = [1, 32], strides = [1, 1]} : vector<1x128xf32> to vector<1x32xf32>
    %97 = arith.mulf %94, %77 : vector<1x32xf32>
    %98 = arith.mulf %93, %95 : vector<1x32xf32>
    %99 = arith.addf %97, %98 : vector<1x32xf32>
    %100 = math.tanh %99 : vector<1x32xf32>
    %101 = arith.mulf %96, %100 : vector<1x32xf32>
    %102 = vector.extract_strided_slice %5 {offsets = [4, 0], sizes = [1, 128], strides = [1, 1]} : vector<8x128xf32> to vector<1x128xf32>
    %c0_31 = arith.constant 0 : index
    %c0_32 = arith.constant 0 : index
    %103 = vector.load %arg2[%c0_31, %c0_32] : memref<32x128xf32, #tpu.memory_space<vmem>>, vector<32x128xf32>
    %cst_33 = arith.constant dense<0.000000e+00> : vector<1x128xf32>
    %104 = tpu.matmul %101, %103, %cst_33 {dimension_numbers = #tpu.dot_dimension_numbers<[1], [0], [0], [1], [0, 0, 1, 1], [], []>, precision = #tpu.contract_precision<fp32>} : vector<1x32xf32>, vector<32x128xf32>, vector<1x128xf32> -> vector<1x128xf32>
    %105 = arith.addf %102, %104 : vector<1x128xf32>
    %106 = math.tanh %105 : vector<1x128xf32>
    %cst_34 = arith.constant 5.000000e-01 : f32
    %107 = vector.broadcast %cst_34 : f32 to vector<1x128xf32>
    %108 = arith.mulf %107, %105 : vector<1x128xf32>
    %109 = math.tanh %108 : vector<1x128xf32>
    %cst_35 = arith.constant 5.000000e-01 : f32
    %110 = vector.broadcast %cst_35 : f32 to vector<1x128xf32>
    %111 = arith.mulf %110, %109 : vector<1x128xf32>
    %cst_36 = arith.constant 5.000000e-01 : f32
    %112 = vector.broadcast %cst_36 : f32 to vector<1x128xf32>
    %113 = arith.addf %111, %112 : vector<1x128xf32>
    %114 = arith.select %11, %106, %113 : vector<1x128xi1>, vector<1x128xf32>
    %115 = vector.extract_strided_slice %114 {offsets = [0, 0], sizes = [1, 32], strides = [1, 1]} : vector<1x128xf32> to vector<1x32xf32>
    %116 = vector.extract_strided_slice %114 {offsets = [0, 32], sizes = [1, 32], strides = [1, 1]} : vector<1x128xf32> to vector<1x32xf32>
    %117 = vector.extract_strided_slice %114 {offsets = [0, 64], sizes = [1, 32], strides = [1, 1]} : vector<1x128xf32> to vector<1x32xf32>
    %118 = vector.extract_strided_slice %114 {offsets = [0, 96], sizes = [1, 32], strides = [1, 1]} : vector<1x128xf32> to vector<1x32xf32>
    %119 = arith.mulf %116, %99 : vector<1x32xf32>
    %120 = arith.mulf %115, %117 : vector<1x32xf32>
    %121 = arith.addf %119, %120 : vector<1x32xf32>
    %122 = math.tanh %121 : vector<1x32xf32>
    %123 = arith.mulf %118, %122 : vector<1x32xf32>
    %124 = vector.extract_strided_slice %5 {offsets = [5, 0], sizes = [1, 128], strides = [1, 1]} : vector<8x128xf32> to vector<1x128xf32>
    %c0_37 = arith.constant 0 : index
    %c0_38 = arith.constant 0 : index
    %125 = vector.load %arg2[%c0_37, %c0_38] : memref<32x128xf32, #tpu.memory_space<vmem>>, vector<32x128xf32>
    %cst_39 = arith.constant dense<0.000000e+00> : vector<1x128xf32>
    %126 = tpu.matmul %123, %125, %cst_39 {dimension_numbers = #tpu.dot_dimension_numbers<[1], [0], [0], [1], [0, 0, 1, 1], [], []>, precision = #tpu.contract_precision<fp32>} : vector<1x32xf32>, vector<32x128xf32>, vector<1x128xf32> -> vector<1x128xf32>
    %127 = arith.addf %124, %126 : vector<1x128xf32>
    %128 = math.tanh %127 : vector<1x128xf32>
    %cst_40 = arith.constant 5.000000e-01 : f32
    %129 = vector.broadcast %cst_40 : f32 to vector<1x128xf32>
    %130 = arith.mulf %129, %127 : vector<1x128xf32>
    %131 = math.tanh %130 : vector<1x128xf32>
    %cst_41 = arith.constant 5.000000e-01 : f32
    %132 = vector.broadcast %cst_41 : f32 to vector<1x128xf32>
    %133 = arith.mulf %132, %131 : vector<1x128xf32>
    %cst_42 = arith.constant 5.000000e-01 : f32
    %134 = vector.broadcast %cst_42 : f32 to vector<1x128xf32>
    %135 = arith.addf %133, %134 : vector<1x128xf32>
    %136 = arith.select %11, %128, %135 : vector<1x128xi1>, vector<1x128xf32>
    %137 = vector.extract_strided_slice %136 {offsets = [0, 0], sizes = [1, 32], strides = [1, 1]} : vector<1x128xf32> to vector<1x32xf32>
    %138 = vector.extract_strided_slice %136 {offsets = [0, 32], sizes = [1, 32], strides = [1, 1]} : vector<1x128xf32> to vector<1x32xf32>
    %139 = vector.extract_strided_slice %136 {offsets = [0, 64], sizes = [1, 32], strides = [1, 1]} : vector<1x128xf32> to vector<1x32xf32>
    %140 = vector.extract_strided_slice %136 {offsets = [0, 96], sizes = [1, 32], strides = [1, 1]} : vector<1x128xf32> to vector<1x32xf32>
    %141 = arith.mulf %138, %121 : vector<1x32xf32>
    %142 = arith.mulf %137, %139 : vector<1x32xf32>
    %143 = arith.addf %141, %142 : vector<1x32xf32>
    %144 = math.tanh %143 : vector<1x32xf32>
    %145 = arith.mulf %140, %144 : vector<1x32xf32>
    %146 = vector.extract_strided_slice %5 {offsets = [6, 0], sizes = [1, 128], strides = [1, 1]} : vector<8x128xf32> to vector<1x128xf32>
    %c0_43 = arith.constant 0 : index
    %c0_44 = arith.constant 0 : index
    %147 = vector.load %arg2[%c0_43, %c0_44] : memref<32x128xf32, #tpu.memory_space<vmem>>, vector<32x128xf32>
    %cst_45 = arith.constant dense<0.000000e+00> : vector<1x128xf32>
    %148 = tpu.matmul %145, %147, %cst_45 {dimension_numbers = #tpu.dot_dimension_numbers<[1], [0], [0], [1], [0, 0, 1, 1], [], []>, precision = #tpu.contract_precision<fp32>} : vector<1x32xf32>, vector<32x128xf32>, vector<1x128xf32> -> vector<1x128xf32>
    %149 = arith.addf %146, %148 : vector<1x128xf32>
    %150 = math.tanh %149 : vector<1x128xf32>
    %cst_46 = arith.constant 5.000000e-01 : f32
    %151 = vector.broadcast %cst_46 : f32 to vector<1x128xf32>
    %152 = arith.mulf %151, %149 : vector<1x128xf32>
    %153 = math.tanh %152 : vector<1x128xf32>
    %cst_47 = arith.constant 5.000000e-01 : f32
    %154 = vector.broadcast %cst_47 : f32 to vector<1x128xf32>
    %155 = arith.mulf %154, %153 : vector<1x128xf32>
    %cst_48 = arith.constant 5.000000e-01 : f32
    %156 = vector.broadcast %cst_48 : f32 to vector<1x128xf32>
    %157 = arith.addf %155, %156 : vector<1x128xf32>
    %158 = arith.select %11, %150, %157 : vector<1x128xi1>, vector<1x128xf32>
    %159 = vector.extract_strided_slice %158 {offsets = [0, 0], sizes = [1, 32], strides = [1, 1]} : vector<1x128xf32> to vector<1x32xf32>
    %160 = vector.extract_strided_slice %158 {offsets = [0, 32], sizes = [1, 32], strides = [1, 1]} : vector<1x128xf32> to vector<1x32xf32>
    %161 = vector.extract_strided_slice %158 {offsets = [0, 64], sizes = [1, 32], strides = [1, 1]} : vector<1x128xf32> to vector<1x32xf32>
    %162 = vector.extract_strided_slice %158 {offsets = [0, 96], sizes = [1, 32], strides = [1, 1]} : vector<1x128xf32> to vector<1x32xf32>
    %163 = arith.mulf %160, %143 : vector<1x32xf32>
    %164 = arith.mulf %159, %161 : vector<1x32xf32>
    %165 = arith.addf %163, %164 : vector<1x32xf32>
    %166 = math.tanh %165 : vector<1x32xf32>
    %167 = arith.mulf %162, %166 : vector<1x32xf32>
    %168 = vector.extract_strided_slice %5 {offsets = [7, 0], sizes = [1, 128], strides = [1, 1]} : vector<8x128xf32> to vector<1x128xf32>
    %c0_49 = arith.constant 0 : index
    %c0_50 = arith.constant 0 : index
    %169 = vector.load %arg2[%c0_49, %c0_50] : memref<32x128xf32, #tpu.memory_space<vmem>>, vector<32x128xf32>
    %cst_51 = arith.constant dense<0.000000e+00> : vector<1x128xf32>
    %170 = tpu.matmul %167, %169, %cst_51 {dimension_numbers = #tpu.dot_dimension_numbers<[1], [0], [0], [1], [0, 0, 1, 1], [], []>, precision = #tpu.contract_precision<fp32>} : vector<1x32xf32>, vector<32x128xf32>, vector<1x128xf32> -> vector<1x128xf32>
    %171 = arith.addf %168, %170 : vector<1x128xf32>
    %172 = math.tanh %171 : vector<1x128xf32>
    %cst_52 = arith.constant 5.000000e-01 : f32
    %173 = vector.broadcast %cst_52 : f32 to vector<1x128xf32>
    %174 = arith.mulf %173, %171 : vector<1x128xf32>
    %175 = math.tanh %174 : vector<1x128xf32>
    %cst_53 = arith.constant 5.000000e-01 : f32
    %176 = vector.broadcast %cst_53 : f32 to vector<1x128xf32>
    %177 = arith.mulf %176, %175 : vector<1x128xf32>
    %cst_54 = arith.constant 5.000000e-01 : f32
    %178 = vector.broadcast %cst_54 : f32 to vector<1x128xf32>
    %179 = arith.addf %177, %178 : vector<1x128xf32>
    %180 = arith.select %11, %172, %179 : vector<1x128xi1>, vector<1x128xf32>
    %181 = vector.extract_strided_slice %180 {offsets = [0, 0], sizes = [1, 32], strides = [1, 1]} : vector<1x128xf32> to vector<1x32xf32>
    %182 = vector.extract_strided_slice %180 {offsets = [0, 32], sizes = [1, 32], strides = [1, 1]} : vector<1x128xf32> to vector<1x32xf32>
    %183 = vector.extract_strided_slice %180 {offsets = [0, 64], sizes = [1, 32], strides = [1, 1]} : vector<1x128xf32> to vector<1x32xf32>
    %184 = vector.extract_strided_slice %180 {offsets = [0, 96], sizes = [1, 32], strides = [1, 1]} : vector<1x128xf32> to vector<1x32xf32>
    %185 = arith.mulf %182, %165 : vector<1x32xf32>
    %186 = arith.mulf %181, %183 : vector<1x32xf32>
    %187 = arith.addf %185, %186 : vector<1x32xf32>
    %188 = math.tanh %187 : vector<1x32xf32>
    %189 = arith.mulf %184, %188 : vector<1x32xf32>
    %190 = tpu.concatenate %35, %57, %79, %101, %123, %145, %167, %189 in 0 : vector<1x32xf32>, vector<1x32xf32>, vector<1x32xf32>, vector<1x32xf32>, vector<1x32xf32>, vector<1x32xf32>, vector<1x32xf32>, vector<1x32xf32> -> vector<8x32xf32>
    %c0_55 = arith.constant 0 : index
    %c0_56 = arith.constant 0 : index
    %191 = vector.load %arg4[%c0_55, %c0_56] : memref<32x128xf32, #tpu.memory_space<vmem>>, vector<32x128xf32>
    %cst_57 = arith.constant dense<0.000000e+00> : vector<8x128xf32>
    %192 = tpu.matmul %190, %191, %cst_57 {dimension_numbers = #tpu.dot_dimension_numbers<[1], [0], [0], [1], [0, 0, 1, 1], [], []>, precision = #tpu.contract_precision<fp32>} : vector<8x32xf32>, vector<32x128xf32>, vector<8x128xf32> -> vector<8x128xf32>
    %c0_58 = arith.constant 0 : index
    %c0_59 = arith.constant 0 : index
    %193 = vector.load %arg5[%c0_58, %c0_59] : memref<1x128xf32, #tpu.memory_space<vmem>>, vector<1x128xf32>
    %194 = vector.broadcast %193 : vector<1x128xf32> to vector<8x128xf32>
    %195 = arith.addf %192, %194 : vector<8x128xf32>
    %c0_60 = arith.constant 0 : index
    %c0_61 = arith.constant 0 : index
    %196 = vector.load %arg6[%c0_60, %c0_61] : memref<8x128xf32, #tpu.memory_space<vmem>>, vector<8x128xf32>
    tpu.vector_store %arg6[%c0_60, %c0_61], %195 {strides = array<i32>} : memref<8x128xf32, #tpu.memory_space<vmem>>, vector<8x128xf32>,
    return
  }
}

</mosaic_0001>

<bundles_post_ra>
// kernel: tpu_custom_call.1
= control target key start
LH: loop header
LB: loop body
LE: loop exit
PB: predicated region body
PF: predicated region fallthrough
CT: control target
= control target key end

     0   :  { %11 = vsyncpa [#allocation3], 0  ;;  %s2872_s0 = inlined_call_operand.hbm [shape: f32[8,16], index: 0, kind: input, shape index: {}]   ;;  %s2873_s1 = inlined_call_operand.hbm [shape: f32[16,128], index: 1, kind: input, shape index: {}]   ;;  %s2874_s2 = inlined_call_operand.hbm [shape: f32[32,128], index: 2, kind: input, shape index: {}]   ;;  %s2875_s3 = inlined_call_operand.vmem [shape: f32[1,128], index: 3, kind: input, shape index: {}]   ;;  %s2876_s4 = inlined_call_operand.hbm [shape: f32[32,128], index: 4, kind: input, shape index: {}]   ;;  %s2877_s5 = inlined_call_operand.vmem [shape: f32[1,128], index: 5, kind: input, shape index: {}]   ;;  %s2878_s6 = inlined_call_operand.hbm [shape: f32[8,128], index: 6, kind: output, shape index: {}]  }
   0x1   :  { %12 = vsyncpa [#allocation6], 0 }
   0x2   :  { %13 = vsyncpa [#allocation9], 0  ;;  %s30_s23 = sshll.u32 %s2873_s1, 4  ;;  %s31_s23 = int_to_ptr.hbm [resolvable:$true] %s30_s23 }
   0x3   :  { %14 = vsyncpa [#allocation4], 0  ;;  %s2443_s24 = smov [#allocation5]   ;;  %s20_s28 = sshll.u32 %s2872_s0, 4  ;;  %s21_s28 = int_to_ptr.hbm [resolvable:$true] %s20_s28 }
   0x4   :  { %s32_s25 = sshll.u32 %s2443_s24, 4  ;;  %s2444_s29 = smov 128   ;;  %s33_s25 = int_to_ptr.vmem [resolvable:$true] %s32_s25 }
   0x5   :  { %s2445_s30 = smov 8   ;;  %s2446_s7 = smov [#allocation2]  }
   0x6   :  { %38 = dma.hbm_to_vmem [thread:$0]  %s31_s23, 256, %s33_s25, [#allocation6], %s2444_s29, %s2444_s29, %s2445_s30  }
   0x7   :  { %s22_s8 = sshll.u32 %s2446_s7, 4  ;;  %s43_s11 = sshll.u32 %s2874_s2, 4  ;;  %s23_s8 = int_to_ptr.vmem [resolvable:$true] %s22_s8  ;;  %s44_s11 = int_to_ptr.hbm [resolvable:$true] %s43_s11 }
   0x8   :  { %25 = dma.hbm_to_vmem [thread:$0]  %s21_s28, 128, %s23_s8, [#allocation3]  }
   0x9   :  { %s58_s13 = sshll.u32 %s2876_s4, 4  ;;  %s2447_s14 = smov [#allocation7]   ;;  %s59_s13 = int_to_ptr.hbm [resolvable:$true] %s58_s13 }
   0xa   :  { %s45_s15 = sshll.u32 %s2447_s14, 4  ;;  %s2448_s0 = smov [#allocation8]   ;;  %s46_s15 = int_to_ptr.vmem [resolvable:$true] %s45_s15 }
   0xb   :  { %51 = dma.hbm_to_vmem [thread:$0]  %s44_s11, 512, %s46_s15, [#allocation6], %s2444_s29, %s2444_s29, %s2445_s30  }
   0xc   :  { %s60_s16 = sshll.u32 %s2448_s0, 4  ;;  %s61_s16 = int_to_ptr.vmem [resolvable:$true] %s60_s16 }
   0xd   :  { %66 = dma.hbm_to_vmem [thread:$0]  %s59_s13, 512, %s61_s16, [#allocation9], %s2444_s29, %s2444_s29, %s2445_s30  }
   0xe   :  { %2435 = dma.done.wait [#allocation3], 128  }
   0xf   :  { %2436 = vsyncadd [#allocation3], 4294967168 }
  0x10   :  { %2437 = dma.done.wait [#allocation6], 768  }
  0x11   :  { %2438 = vsyncadd [#allocation6], 4294966528 }
  0x12   :  { %2439 = dma.done.wait [#allocation9], 512  }
  0x13   :  { %2440 = vsyncadd [#allocation9], 4294966784  ;;  %vm92_vm0 = vcmask 130048   ;;  %v87_v0 = vld [vmem:[#allocation5 + $0x8] sm:$0xff]  ;;  %v86_v1 = vld [vmem:[#allocation5] sm:$0xff]  ;;  %v2449_v43 = vmov 0.0  }
  0x14   :  { %v85_v2 = vld [vmem:[#allocation2] sm:$0xff]  ;;  %v110_v3 = vand.u32 4294901760, %v87_v0  ;;  %v112_v4 = vand.u32 4294901760, %v86_v1  ;;  %v263_v6 = vld [vmem:[#allocation7 + $0x18] sm:$0xff]  ;;  %v262_v7 = vld [vmem:[#allocation7 + $0x10] sm:$0xff]  ;;  %s2451_s17 = smov 32  }
  0x15   :  { %v94_v5 = vsel %vm92_vm0, %v85_v2, 0  ;;  %v261_v8 = vld [vmem:[#allocation7 + $0x8] sm:$0xff]  ;;  %v2502_v10 = vand.u32 4294901760, %v263_v6  ;;  %v2504_v11 = vand.u32 4294901760, %v262_v7  ;;  %v260_v13 = vld [vmem:[#allocation7] sm:$0xff]  ;;  %vm264_vm4 = vcmask 261120  }
  0x16   :  { %v2500_v9 = vand.u32 4294901760, %v94_v5  ;;  %v2506_v12 = vand.u32 4294901760, %v261_v8  ;;  %v138_v14 = vsub.f32 %v87_v0, %v110_v3  ;;  %195 = vmatpush.msra.mxu3 %v110_v3  ;;  %111 = vmatpush.msra.mxu0 %v110_v3  ;;  %v144_v15 = vsub.f32 %v86_v1, %v112_v4  ;;  %v2265_v44 = vld [vmem:[%s2875_s3] ss:$0 sm:$0xff]  ;;  %s2450_s3 = smov 64   ;;  %s2452_s20 = smov [#allocation10]  }
  0x17   :  { %v2508_v16 = vand.u32 4294901760, %v260_v13  ;;  %v2512_v18 = vsub.f32 %v263_v6, %v2502_v10  ;;  %v2515_v19 = vsub.f32 %v262_v7, %v2504_v11  ;;  %vm2023_vm5 = vcmask 1040384   ;;  %s2241_s21 = sshll.u32 %s2452_s20, 4  ;;  %s2243_s24 = sshll.u32 %s2878_s6, 4  ;;  %s2242_s21 = int_to_ptr.vmem [resolvable:$true] %s2241_s21  ;;  %s2244_s24 = int_to_ptr.hbm [resolvable:$true] %s2243_s24 }
  0x18   :  { %v115_v17 = vsub.f32 %v94_v5, %v2500_v9  ;;  %v2518_v20 = vsub.f32 %v261_v8, %v2506_v12  ;;  %170 = vmatpush.msra.mxu2 %v138_v14  ;;  %197 = vmatpush.msra.mxu3 %v112_v4  ;;  %v139_v21 = vand.u32 4294901760, %v138_v14  ;;  %v145_v22 = vand.u32 4294901760, %v144_v15 }
  0x19   :  { %v2521_v23 = vsub.f32 %v260_v13, %v2508_v16  ;;  %113 = vmatpush.msra.mxu0 %v112_v4  ;;  %v2524_v25 = vand.u32 4294901760, %v2512_v18  ;;  %v2527_v26 = vand.u32 4294901760, %v2515_v19  ;;  %v255_v5 = vlaneseq }
  0x1a   :  { %v116_v24 = vand.u32 4294901760, %v115_v17  ;;  %v2530_v27 = vand.u32 4294901760, %v2518_v20  ;;  %173 = vmatpush.msra.mxu2 %v144_v15  ;;  %v140_v28 = vsub.f32 %v138_v14, %v139_v21  ;;  %v146_v29 = vsub.f32 %v144_v15, %v145_v22 }
  0x1b   :  { %222 = vmatpush.msrb.mxu0 %v139_v21  ;;  %v2533_v30 = vand.u32 4294901760, %v2521_v23  ;;  %176 = vmatmul.f32.vlgmr.msra.gmra.mxu2 %v115_v17  ;;  %v312_v31 = vsub.f32 %v2512_v18, %v2524_v25  ;;  %v318_v33 = vsub.f32 %v2515_v19, %v2527_v26  ;;  %v256_v7 = vand.u32 127, %v255_v5 }
  0x1c   :  { %201 = vmatmul.f32.vlgmr.msra.gmra.mxu3 %v116_v24  ;;  %v117_v32 = vsub.f32 %v115_v17, %v116_v24  ;;  %281 = vmatpush.msrb.mxu2 %v2502_v10  ;;  %v141_v34 = vand.u32 4294901760, %v140_v28  ;;  %v147_v35 = vand.u32 4294901760, %v146_v29  ;;  %v324_v36 = vsub.f32 %v2518_v20, %v2530_v27 }
  0x1d   :  { %226 = vmatpush.msrb.mxu0 %v145_v22  ;;  %v2542_v37 = vand.u32 4294901760, %v312_v31  ;;  %v2544_v39 = vand.u32 4294901760, %v318_v33  ;;  %v330_v40 = vsub.f32 %v2521_v23, %v2533_v30  ;;  %vm257_vm1 = vcmp.ge.s32.totalorder %v256_v7, 64 }
  0x1e   :  { %v118_v38 = vand.u32 4294901760, %v117_v32  ;;  %142 = vmatpush.msra.mxu1 %v141_v34  ;;  %283 = vmatpush.msrb.mxu2 %v2504_v11  ;;  %v2550_v41 = vand.u32 4294901760, %v324_v36  ;;  %vm258_vm2 = vcmp.lt.s32.totalorder %v256_v7, 96  ;;  %vm2025_vm6 = vcmask 1041408  }
  0x1f   :  { %314 = vmatpush.msrb.mxu3 %v2542_v37  ;;  %v2555_v42 = vand.u32 4294901760, %v330_v40  ;;  %vm2616_vm3 = vmand %vm257_vm1, %vm258_vm2  ;;  %vm2027_vm7 = vcmask 1042432   ;;  %vm2029_vm8 = vcmask 1043456   ;;  %vm2031_vm9 = vcmask 1044480  }
  0x20   :  { %119 = vmatmul.f32.vlgmr.msra.gmra.mxu0 %v118_v38  ;;  %148 = vmatpush.msra.mxu1 %v147_v35  ;;  %vm2033_vm10 = vcmask 1045504   ;;  %vm2035_vm11 = vcmask 1046528  }
  0x21   :  { %285 = vmatpush.msrb.mxu2 %v2506_v12  ;;  %320 = vmatpush.msrb.mxu3 %v2544_v39 }
  0x22   :  { %150 = vmatmul.f32.vlgmr.msra.gmra.mxu1 %v2500_v9  ;;  %352 = vmatpush.msra.mxu0 %v2512_v18 }
  0x23   :  { %247 = vmatpush.msrb.mxu1 %v110_v3  ;;  %287 = vmatpush.msrb.mxu2 %v2508_v16 }
  0x24   :  { %326 = vmatpush.msrb.mxu3 %v2550_v41  ;;  %293 = vmatmul.f32.vlgmr.msrb.gmra.mxu2 %v2449_v43 }
  0x25   :  { %249 = vmatpush.msrb.mxu1 %v112_v4  ;;  %410 = vmatpush.msra.mxu2 %v2524_v25 }
  0x26   :  { %332 = vmatpush.msrb.mxu3 %v2555_v42  ;;  %355 = vmatpush.msra.mxu0 %v2515_v19 }
  0x27   :  { %334 = vmatmul.f32.vlgmr.msrb.gmra.mxu3 %v2449_v43  ;;  %414 = vmatpush.msra.mxu2 %v2527_v26 }
  0x28   :  { %228 = vmatmul.f32.vlgmr.msrb.gmra.mxu0 %v2500_v9  ;;  %441 = vmatpush.msra.mxu3 %v2502_v10 }
  0x29   :  { %381 = vmatpush.msra.mxu1 %v2502_v10  ;;  %418 = vmatpush.msra.mxu2 %v2530_v27 }
  0x2a   :  { %251 = vmatmul.f32.vlgmr.msrb.gmra.mxu1 %v2500_v9  ;;  %443 = vmatpush.msra.mxu3 %v2504_v11 }
  0x2b   :  { %358 = vmatpush.msra.mxu0 %v2518_v20  ;;  %383 = vmatpush.msra.mxu1 %v2504_v11 }
  0x2c   :  { %422 = vmatpush.msra.mxu2 %v2533_v30  ;;  %445 = vmatpush.msra.mxu3 %v2506_v12 }
  0x2d   :  { %361 = vmatpush.msra.mxu0 %v2521_v23  ;;  %385 = vmatpush.msra.mxu1 %v2506_v12 }
  0x2e   :  { %424 = vmatmul.f32.vlgmr.msra.gmra.mxu2 %v2449_v43  ;;  %447 = vmatpush.msra.mxu3 %v2508_v16 }
  0x2f   :  { %566 = vmatpush.msrb.mxu2 %v2512_v18  ;;  %387 = vmatpush.msra.mxu1 %v2508_v16 }
  0x30   :  { %364 = vmatmul.f32.vlgmr.msra.gmra.mxu0 %v2449_v43  ;;  %449 = vmatmul.f32.vlgmr.msra.gmra.mxu3 %v2449_v43 }
  0x31   :  { %528 = vmatpush.msrb.mxu1 %v2542_v37  ;;  %569 = vmatpush.msrb.mxu2 %v2515_v19 }
  0x32   :  { %391 = vmatmul.f32.vlgmr.msra.gmra.mxu1 %v2449_v43  ;;  %595 = vmatpush.msrb.mxu3 %v2502_v10 }
  0x33   :  { %534 = vmatpush.msrb.mxu1 %v2544_v39  ;;  %572 = vmatpush.msrb.mxu2 %v2518_v20 }
  0x34   :  { %495 = vmatpush.msrb.mxu0 %v2502_v10  ;;  %597 = vmatpush.msrb.mxu3 %v2504_v11 }
  0x35   :  { %540 = vmatpush.msrb.mxu1 %v2550_v41  ;;  %575 = vmatpush.msrb.mxu2 %v2521_v23 }
  0x36   :  { %497 = vmatpush.msrb.mxu0 %v2504_v11  ;;  %599 = vmatpush.msrb.mxu3 %v2506_v12 }
  0x37   :  { %546 = vmatpush.msrb.mxu1 %v2555_v42  ;;  %716 = vmatpush.msra.mxu2 %v2502_v10 }
  0x38   :  { %499 = vmatpush.msrb.mxu0 %v2506_v12  ;;  %601 = vmatpush.msrb.mxu3 %v2508_v16 }
  0x39   :  { %655 = vmatpush.msra.mxu1 %v2502_v10  ;;  %718 = vmatpush.msra.mxu2 %v2504_v11 }
  0x3a   :  { %501 = vmatpush.msrb.mxu0 %v2508_v16  ;;  %749 = vmatpush.msra.mxu3 %v2542_v37 }
  0x3b   :  { %657 = vmatpush.msra.mxu1 %v2504_v11  ;;  %720 = vmatpush.msra.mxu2 %v2506_v12 }
  0x3c   :  { %624 = vmatpush.msra.mxu0 %v2524_v25  ;;  %755 = vmatpush.msra.mxu3 %v2544_v39 }
  0x3d   :  { %659 = vmatpush.msra.mxu1 %v2506_v12  ;;  %722 = vmatpush.msra.mxu2 %v2508_v16 }
  0x3e   :  { %628 = vmatpush.msra.mxu0 %v2527_v26  ;;  %761 = vmatpush.msra.mxu3 %v2550_v41 }
  0x3f   :  { %661 = vmatpush.msra.mxu1 %v2508_v16 }
  0x40   :  { %632 = vmatpush.msra.mxu0 %v2530_v27  ;;  %767 = vmatpush.msra.mxu3 %v2555_v42 }
  0x42   :  { %636 = vmatpush.msra.mxu0 %v2533_v30 }
  0x9d   :  { %v120_v45 = vpop.f32.mrf.mxu0 }
  0x9e   :  { %v177_v47 = vpop.f32.mrf.mxu2  ;;  %v121_v49 = vadd.f32 %v2265_v44, %v120_v45 }
  0x9f   :  { %v151_v46 = vpop.f32.mrf.mxu1  ;;  %v202_v48 = vpop.f32.mrf.mxu3 }
  0xa0   :  { %v152_v50 = vadd.f32 %v151_v46, %v121_v49 }
  0xa2   :  { %v178_v54 = vadd.f32 %v177_v47, %v152_v50 }
  0xa4   :  { %v203_v57 = vadd.f32 %v202_v48, %v178_v54 }
  0xa5   :  { %v229_v51 = vpop.f32.mrf.mxu0 }
  0xa6   :  { %v230_v62 = vadd.f32 %v229_v51, %v203_v57 }
  0xa7   :  { %v252_v52 = vpop.f32.mrf.mxu1  ;;  %v294_v53 = vpop.f32.mrf.mxu2 }
  0xa8   :  { %v2613_v2 = vadd.f32 %v252_v52, %v230_v62 }
  0xaa   :  { %v335_v55 = vpop.f32.mrf.mxu3 }
  0xab   :  { %v336_v56 = vadd.f32 %v335_v55, %v294_v53 }
  0xad   :  { %v365_v58 = vpop.f32.mrf.mxu0 }
  0xae   :  { %v366_v59 = vadd.f32 %v365_v58, %v336_v56 }
  0xaf   :  { %v392_v60 = vpop.f32.mrf.mxu1 }
  0xb0   :  { %v393_v61 = vadd.f32 %v392_v60, %v366_v59 }
  0xb1   :  { %v425_v63 = vpop.f32.mrf.mxu2 }
  0xb2   :  { %v426_v0 = vadd.f32 %v425_v63, %v393_v61 }
  0xb3   :  { %v450_v1 = vpop.f32.mrf.mxu3 }
  0xb4   :  { %v451_v3 = vadd.f32 %v450_v1, %v426_v0 }
  0xb6   :  { %v453_v4 = vadd.f32 %v451_v3, %v2613_v2 }
  0xb8   :  { %v455_v6 = vmul.f32 0.5, %v453_v4 }
  0xba   :  { %2267 = vtanh.f32 %v455_v6 }
  0xbb   :  { %2269 = vtanh.f32 %v453_v4 }
  0xc0   :  { %v2268_v8 = vpop.eup %2267 }
  0xc1   :  { %v457_v9 = vmul.f32 0.5, %v2268_v8  ;;  %v2270_v15 = vpop.eup %2269 }
  0xc3   :  { %v458_v14 = vadd.f32 0.5, %v457_v9 }
  0xc5   :  { %v459_v17 = vsel %vm2616_vm3, %v2270_v15, %v458_v14 }
  0xc6   :  { %462 = vrot.lane.b32.xlu0 %v459_v17, %s2450_s3  ;;  %v460_v24 = vmul.f32 0.0, %v459_v17 }
 0x138   :  { %v463_v21 = vpop.permute.xlu0 %462 }
 0x139   :  { %v465_v22 = vmul.f32 %v463_v21, %v459_v17 }
 0x13b   :  { %467 = vrot.lane.b32.xlu0 %v465_v22, %s2451_s17 }
 0x1ad   :  { %v468_v28 = vpop.permute.xlu0 %467 }
 0x1ae   :  { %v2624_v29 = vadd.f32 %v468_v28, %v460_v24 }
 0x1b0   :  { %2271 = vtanh.f32 %v2624_v29  ;;  %v678_v3 = vrot.slane %v2624_v29, 7 }
 0x1b6   :  { %v2272_v31 = vpop.eup %2271 }
 0x1b7   :  { %473 = vrot.lane.b32.xlu1 %v2272_v31, %s2450_s3 }
 0x229   :  { %v474_v32 = vpop.permute.xlu1 %473 }
 0x22a   :  { %v2628_v33 = vmul.f32 %v474_v32, %v459_v17 }
 0x22c   :  { %478 = vrot.lane.b32.xlu1 %v2628_v33, %s2451_s17 }
 0x29e   :  { %v479_v34 = vpop.permute.xlu1 %478 }
 0x29f   :  { %v480_v35 = vsel %vm264_vm4, %v479_v34, 0 }
 0x2a0   :  { %v502_v36 = vand.u32 4294901760, %v480_v35 }
 0x2a2   :  { %v503_v38 = vsub.f32 %v480_v35, %v502_v36  ;;  %548 = vmatmul.f32.vlgmr.msrb.gmra.mxu1 %v502_v36 }
 0x2a3   :  { %816 = vmatpush.msrb.mxu1 %v2502_v10 }
 0x2a4   :  { %v504_v40 = vand.u32 4294901760, %v503_v38  ;;  %578 = vmatmul.f32.vlgmr.msrb.gmra.mxu2 %v503_v38 }
 0x2a5   :  { %818 = vmatpush.msrb.mxu1 %v2504_v11  ;;  %845 = vmatpush.msrb.mxu2 %v2524_v25 }
 0x2a6   :  { %v505_v43 = vsub.f32 %v503_v38, %v504_v40  ;;  %605 = vmatmul.f32.vlgmr.msrb.gmra.mxu3 %v504_v40 }
 0x2a7   :  { %820 = vmatpush.msrb.mxu1 %v2506_v12  ;;  %876 = vmatpush.msrb.mxu3 %v2502_v10 }
 0x2a8   :  { %v506_v44 = vand.u32 4294901760, %v505_v43  ;;  %849 = vmatpush.msrb.mxu2 %v2527_v26 }
 0x2a9   :  { %822 = vmatpush.msrb.mxu1 %v2508_v16  ;;  %878 = vmatpush.msrb.mxu3 %v2504_v11 }
 0x2aa   :  { %507 = vmatmul.f32.vlgmr.msrb.gmra.mxu0 %v506_v44  ;;  %663 = vmatmul.f32.vlgmr.msra.gmra.mxu1 %v502_v36 }
 0x2ab   :  { %787 = vmatpush.msrb.mxu0 %v2512_v18  ;;  %880 = vmatpush.msrb.mxu3 %v2506_v12 }
 0x2ac   :  { %853 = vmatpush.msrb.mxu2 %v2530_v27  ;;  %970 = vmatpush.msra.mxu1 %v2542_v37 }
 0x2ad   :  { %790 = vmatpush.msrb.mxu0 %v2515_v19  ;;  %882 = vmatpush.msrb.mxu3 %v2508_v16 }
 0x2ae   :  { %857 = vmatpush.msrb.mxu2 %v2533_v30  ;;  %976 = vmatpush.msra.mxu1 %v2544_v39 }
 0x2af   :  { %793 = vmatpush.msrb.mxu0 %v2518_v20 }
 0x2b0   :  { %982 = vmatpush.msra.mxu1 %v2550_v41 }
 0x2b1   :  { %796 = vmatpush.msrb.mxu0 %v2521_v23 }
 0x2b2   :  { %638 = vmatmul.f32.vlgmr.msra.gmra.mxu0 %v502_v36  ;;  %988 = vmatpush.msra.mxu1 %v2555_v42 }
 0x2b3   :  { %937 = vmatpush.msra.mxu0 %v2502_v10 }
 0x2b5   :  { %939 = vmatpush.msra.mxu0 %v2504_v11 }
 0x2b7   :  { %941 = vmatpush.msra.mxu0 %v2506_v12 }
 0x2b9   :  { %943 = vmatpush.msra.mxu0 %v2508_v16 }
 0x31f   :  { %v549_v45 = vpop.f32.mrf.mxu1 }
 0x327   :  { %v508_v46 = vpop.f32.mrf.mxu0  ;;  %v579_v48 = vpop.f32.mrf.mxu2 }
 0x328   :  { %v550_v47 = vadd.f32 %v549_v45, %v508_v46  ;;  %v664_v54 = vpop.f32.mrf.mxu1 }
 0x329   :  { %v606_v50 = vpop.f32.mrf.mxu3 }
 0x32a   :  { %v580_v49 = vadd.f32 %v579_v48, %v550_v47 }
 0x32c   :  { %v607_v51 = vadd.f32 %v606_v50, %v580_v49 }
 0x32f   :  { %v639_v52 = vpop.f32.mrf.mxu0 }
 0x330   :  { %v640_v53 = vadd.f32 %v639_v52, %v607_v51 }
 0x332   :  { %v665_v55 = vadd.f32 %v664_v54, %v640_v53 }
 0x334   :  { %v668_v56 = vrot.slane %v665_v55, 7 }
 0x336   :  { %v670_v57 = vadd.f32 %v668_v56, %v2613_v2 }
 0x338   :  { %v672_v58 = vmul.f32 0.5, %v670_v57 }
 0x33a   :  { %2273 = vtanh.f32 %v672_v58 }
 0x33b   :  { %2275 = vtanh.f32 %v670_v57 }
 0x340   :  { %v2274_v59 = vpop.eup %2273 }
 0x341   :  { %v674_v60 = vmul.f32 0.5, %v2274_v59  ;;  %v2276_v62 = vpop.eup %2275 }
 0x343   :  { %v675_v61 = vadd.f32 0.5, %v674_v60 }
 0x345   :  { %v676_v63 = vsel %vm2616_vm3, %v2276_v62, %v675_v61 }
 0x346   :  { %682 = vrot.lane.b32.xlu2 %v676_v63, %s2450_s3  ;;  %v680_v4 = vmul.f32 %v678_v3, %v676_v63 }
 0x3a0   :  { %v683_v0 = vpop.permute.xlu2 %682 }
 0x3a1   :  { %v685_v1 = vmul.f32 %v683_v0, %v676_v63 }
 0x3a3   :  { %687 = vrot.lane.b32.xlu2 %v685_v1, %s2451_s17 }
 0x3fd   :  { %v688_v5 = vpop.permute.xlu2 %687 }
 0x3fe   :  { %v2663_v6 = vadd.f32 %v688_v5, %v680_v4 }
 0x400   :  { %2277 = vtanh.f32 %v2663_v6  ;;  %v899_v57 = vrot.slane %v2663_v6, 7 }
 0x406   :  { %v2278_v7 = vpop.eup %2277 }
 0x407   :  { %693 = vrot.lane.b32.xlu0 %v2278_v7, %s2450_s3 }
 0x479   :  { %v694_v8 = vpop.permute.xlu0 %693 }
 0x47a   :  { %v2667_v9 = vmul.f32 %v694_v8, %v676_v63 }
 0x47c   :  { %v698_v14 = vrot.slane %v2667_v9, 1  ;;  %v2024_v0 = vsel %vm2023_vm5, %v2628_v33, %v2667_v9 }
 0x47e   :  { %699 = vrot.lane.b32.xlu1 %v698_v14, %s2451_s17 }
 0x4f0   :  { %v700_v15 = vpop.permute.xlu1 %699 }
 0x4f1   :  { %v701_v17 = vsel %vm264_vm4, %v700_v15, 0 }
 0x4f2   :  { %v723_v21 = vand.u32 4294901760, %v701_v17 }
 0x4f4   :  { %v724_v22 = vsub.f32 %v701_v17, %v723_v21  ;;  %769 = vmatmul.f32.vlgmr.msra.gmra.mxu3 %v723_v21 }
 0x4f5   :  { %1037 = vmatpush.msra.mxu3 %v2502_v10 }
 0x4f6   :  { %v725_v24 = vand.u32 4294901760, %v724_v22  ;;  %799 = vmatmul.f32.vlgmr.msrb.gmra.mxu0 %v724_v22 }
 0x4f7   :  { %1039 = vmatpush.msra.mxu3 %v2504_v11  ;;  %1066 = vmatpush.msrb.mxu0 %v2524_v25 }
 0x4f8   :  { %v726_v28 = vsub.f32 %v724_v22, %v725_v24  ;;  %826 = vmatmul.f32.vlgmr.msrb.gmra.mxu1 %v725_v24 }
 0x4f9   :  { %1041 = vmatpush.msra.mxu3 %v2506_v12  ;;  %1097 = vmatpush.msrb.mxu1 %v2502_v10 }
 0x4fa   :  { %v727_v29 = vand.u32 4294901760, %v726_v28  ;;  %1070 = vmatpush.msrb.mxu0 %v2527_v26 }
 0x4fb   :  { %1043 = vmatpush.msra.mxu3 %v2508_v16  ;;  %1099 = vmatpush.msrb.mxu1 %v2504_v11 }
 0x4fc   :  { %728 = vmatmul.f32.vlgmr.msra.gmra.mxu2 %v727_v29  ;;  %884 = vmatmul.f32.vlgmr.msrb.gmra.mxu3 %v723_v21 }
 0x4fd   :  { %1008 = vmatpush.msra.mxu2 %v2512_v18  ;;  %1101 = vmatpush.msrb.mxu1 %v2506_v12 }
 0x4fe   :  { %1074 = vmatpush.msrb.mxu0 %v2530_v27  ;;  %1191 = vmatpush.msrb.mxu3 %v2542_v37 }
 0x4ff   :  { %1011 = vmatpush.msra.mxu2 %v2515_v19  ;;  %1103 = vmatpush.msrb.mxu1 %v2508_v16 }
 0x500   :  { %1078 = vmatpush.msrb.mxu0 %v2533_v30  ;;  %1197 = vmatpush.msrb.mxu3 %v2544_v39 }
 0x501   :  { %1014 = vmatpush.msra.mxu2 %v2518_v20 }
 0x502   :  { %1203 = vmatpush.msrb.mxu3 %v2550_v41 }
 0x503   :  { %1017 = vmatpush.msra.mxu2 %v2521_v23 }
 0x504   :  { %859 = vmatmul.f32.vlgmr.msrb.gmra.mxu2 %v723_v21  ;;  %1209 = vmatpush.msrb.mxu3 %v2555_v42 }
 0x505   :  { %1158 = vmatpush.msrb.mxu2 %v2502_v10 }
 0x507   :  { %1160 = vmatpush.msrb.mxu2 %v2504_v11 }
 0x509   :  { %1162 = vmatpush.msrb.mxu2 %v2506_v12 }
 0x50b   :  { %1164 = vmatpush.msrb.mxu2 %v2508_v16 }
 0x573   :  { %v800_v35 = vpop.f32.mrf.mxu0 }
 0x575   :  { %v827_v38 = vpop.f32.mrf.mxu1 }
 0x577   :  { %v770_v31 = vpop.f32.mrf.mxu3 }
 0x57f   :  { %v729_v32 = vpop.f32.mrf.mxu2  ;;  %v885_v45 = vpop.f32.mrf.mxu3 }
 0x580   :  { %v771_v34 = vadd.f32 %v770_v31, %v729_v32 }
 0x582   :  { %v801_v36 = vadd.f32 %v800_v35, %v771_v34 }
 0x584   :  { %v828_v40 = vadd.f32 %v827_v38, %v801_v36 }
 0x587   :  { %v860_v43 = vpop.f32.mrf.mxu2 }
 0x588   :  { %v861_v44 = vadd.f32 %v860_v43, %v828_v40 }
 0x58a   :  { %v886_v46 = vadd.f32 %v885_v45, %v861_v44 }
 0x58c   :  { %v889_v47 = vrot.slane %v886_v46, 6 }
 0x58e   :  { %v891_v48 = vadd.f32 %v889_v47, %v2613_v2 }
 0x590   :  { %v893_v49 = vmul.f32 0.5, %v891_v48 }
 0x592   :  { %2279 = vtanh.f32 %v893_v49 }
 0x593   :  { %2281 = vtanh.f32 %v891_v48 }
 0x598   :  { %v2280_v50 = vpop.eup %2279 }
 0x599   :  { %v895_v51 = vmul.f32 0.5, %v2280_v50  ;;  %v2282_v53 = vpop.eup %2281 }
 0x59b   :  { %v896_v52 = vadd.f32 0.5, %v895_v51 }
 0x59d   :  { %v897_v54 = vsel %vm2616_vm3, %v2282_v53, %v896_v52 }
 0x59e   :  { %903 = vrot.lane.b32.xlu2 %v897_v54, %s2450_s3  ;;  %v901_v58 = vmul.f32 %v899_v57, %v897_v54 }
 0x5f8   :  { %v904_v55 = vpop.permute.xlu2 %903 }
 0x5f9   :  { %v906_v56 = vmul.f32 %v904_v55, %v897_v54 }
 0x5fb   :  { %908 = vrot.lane.b32.xlu0 %v906_v56, %s2451_s17 }
 0x66d   :  { %v909_v59 = vpop.permute.xlu0 %908 }
 0x66e   :  { %v2702_v60 = vadd.f32 %v909_v59, %v901_v58 }
 0x670   :  { %2283 = vtanh.f32 %v2702_v60  ;;  %v1120_v49 = vrot.slane %v2702_v60, 7 }
 0x676   :  { %v2284_v61 = vpop.eup %2283 }
 0x677   :  { %914 = vrot.lane.b32.xlu1 %v2284_v61, %s2450_s3 }
 0x6e9   :  { %v915_v62 = vpop.permute.xlu1 %914 }
 0x6ea   :  { %v917_v63 = vmul.f32 %v915_v62, %v897_v54 }
 0x6ec   :  { %v919_v1 = vrot.slane %v917_v63, 2  ;;  %v2708_v3 = vsel %vm2025_vm6, %v2024_v0, %v917_v63 }
 0x6ee   :  { %920 = vrot.lane.b32.xlu2 %v919_v1, %s2451_s17 }
 0x748   :  { %v921_v4 = vpop.permute.xlu2 %920 }
 0x749   :  { %v922_v5 = vsel %vm264_vm4, %v921_v4, 0 }
 0x74a   :  { %v944_v6 = vand.u32 4294901760, %v922_v5 }
 0x74c   :  { %v945_v7 = vsub.f32 %v922_v5, %v944_v6  ;;  %990 = vmatmul.f32.vlgmr.msra.gmra.mxu1 %v944_v6 }
 0x74d   :  { %1258 = vmatpush.msra.mxu1 %v2502_v10 }
 0x74e   :  { %v946_v8 = vand.u32 4294901760, %v945_v7  ;;  %1020 = vmatmul.f32.vlgmr.msra.gmra.mxu2 %v945_v7 }
 0x74f   :  { %1260 = vmatpush.msra.mxu1 %v2504_v11  ;;  %1287 = vmatpush.msra.mxu2 %v2524_v25 }
 0x750   :  { %v947_v33 = vsub.f32 %v945_v7, %v946_v8  ;;  %1047 = vmatmul.f32.vlgmr.msra.gmra.mxu3 %v946_v8 }
 0x751   :  { %1262 = vmatpush.msra.mxu1 %v2506_v12  ;;  %1318 = vmatpush.msra.mxu3 %v2502_v10 }
 0x752   :  { %v948_v9 = vand.u32 4294901760, %v947_v33  ;;  %1291 = vmatpush.msra.mxu2 %v2527_v26 }
 0x753   :  { %1264 = vmatpush.msra.mxu1 %v2508_v16  ;;  %1320 = vmatpush.msra.mxu3 %v2504_v11 }
 0x754   :  { %949 = vmatmul.f32.vlgmr.msra.gmra.mxu0 %v948_v9  ;;  %1105 = vmatmul.f32.vlgmr.msrb.gmra.mxu1 %v944_v6 }
 0x755   :  { %1229 = vmatpush.msra.mxu0 %v2512_v18  ;;  %1322 = vmatpush.msra.mxu3 %v2506_v12 }
 0x756   :  { %1295 = vmatpush.msra.mxu2 %v2530_v27  ;;  %1412 = vmatpush.msrb.mxu1 %v2542_v37 }
 0x757   :  { %1232 = vmatpush.msra.mxu0 %v2515_v19  ;;  %1324 = vmatpush.msra.mxu3 %v2508_v16 }
 0x758   :  { %1299 = vmatpush.msra.mxu2 %v2533_v30  ;;  %1418 = vmatpush.msrb.mxu1 %v2544_v39 }
 0x759   :  { %1235 = vmatpush.msra.mxu0 %v2518_v20 }
 0x75a   :  { %1424 = vmatpush.msrb.mxu1 %v2550_v41 }
 0x75b   :  { %1238 = vmatpush.msra.mxu0 %v2521_v23 }
 0x75c   :  { %1080 = vmatmul.f32.vlgmr.msrb.gmra.mxu0 %v944_v6  ;;  %1430 = vmatpush.msrb.mxu1 %v2555_v42 }
 0x75d   :  { %1379 = vmatpush.msrb.mxu0 %v2502_v10 }
 0x75f   :  { %1381 = vmatpush.msrb.mxu0 %v2504_v11 }
 0x761   :  { %1383 = vmatpush.msrb.mxu0 %v2506_v12 }
 0x763   :  { %1385 = vmatpush.msrb.mxu0 %v2508_v16 }
 0x7c9   :  { %v991_v14 = vpop.f32.mrf.mxu1 }
 0x7d1   :  { %v950_v15 = vpop.f32.mrf.mxu0  ;;  %v1021_v21 = vpop.f32.mrf.mxu2 }
 0x7d2   :  { %v992_v17 = vadd.f32 %v991_v14, %v950_v15  ;;  %v1106_v32 = vpop.f32.mrf.mxu1 }
 0x7d3   :  { %v1048_v24 = vpop.f32.mrf.mxu3 }
 0x7d4   :  { %v1022_v22 = vadd.f32 %v1021_v21, %v992_v17 }
 0x7d6   :  { %v1049_v28 = vadd.f32 %v1048_v24, %v1022_v22 }
 0x7d9   :  { %v1081_v29 = vpop.f32.mrf.mxu0 }
 0x7da   :  { %v1082_v31 = vadd.f32 %v1081_v29, %v1049_v28 }
 0x7dc   :  { %v1107_v34 = vadd.f32 %v1106_v32, %v1082_v31 }
 0x7de   :  { %v1110_v35 = vrot.slane %v1107_v34, 5 }
 0x7e0   :  { %v1112_v36 = vadd.f32 %v1110_v35, %v2613_v2 }
 0x7e2   :  { %v1114_v38 = vmul.f32 0.5, %v1112_v36 }
 0x7e4   :  { %2285 = vtanh.f32 %v1114_v38 }
 0x7e5   :  { %2287 = vtanh.f32 %v1112_v36 }
 0x7ea   :  { %v2286_v40 = vpop.eup %2285 }
 0x7eb   :  { %v1116_v43 = vmul.f32 0.5, %v2286_v40  ;;  %v2288_v45 = vpop.eup %2287 }
 0x7ed   :  { %v1117_v44 = vadd.f32 0.5, %v1116_v43 }
 0x7ef   :  { %v1118_v46 = vsel %vm2616_vm3, %v2288_v45, %v1117_v44 }
 0x7f0   :  { %1124 = vrot.lane.b32.xlu0 %v1118_v46, %s2450_s3  ;;  %v1122_v50 = vmul.f32 %v1120_v49, %v1118_v46 }
 0x862   :  { %v1125_v47 = vpop.permute.xlu0 %1124 }
 0x863   :  { %v1127_v48 = vmul.f32 %v1125_v47, %v1118_v46 }
 0x865   :  { %1129 = vrot.lane.b32.xlu1 %v1127_v48, %s2451_s17 }
 0x8d7   :  { %v1130_v51 = vpop.permute.xlu1 %1129 }
 0x8d8   :  { %v2742_v52 = vadd.f32 %v1130_v51, %v1122_v50 }
 0x8da   :  { %2289 = vtanh.f32 %v2742_v52  ;;  %v1341_v36 = vrot.slane %v2742_v52, 7 }
 0x8e0   :  { %v2290_v53 = vpop.eup %2289 }
 0x8e1   :  { %1135 = vrot.lane.b32.xlu2 %v2290_v53, %s2450_s3 }
 0x93b   :  { %v1136_v54 = vpop.permute.xlu2 %1135 }
 0x93c   :  { %v1138_v55 = vmul.f32 %v1136_v54, %v1118_v46 }
 0x93e   :  { %v1140_v56 = vrot.slane %v1138_v55, 3  ;;  %v2747_v57 = vsel %vm2027_vm7, %v2708_v3, %v1138_v55 }
 0x940   :  { %1141 = vrot.lane.b32.xlu0 %v1140_v56, %s2451_s17 }
 0x9b2   :  { %v1142_v58 = vpop.permute.xlu0 %1141 }
 0x9b3   :  { %v1143_v59 = vsel %vm264_vm4, %v1142_v58, 0 }
 0x9b4   :  { %v1165_v60 = vand.u32 4294901760, %v1143_v59 }
 0x9b6   :  { %v1166_v61 = vsub.f32 %v1143_v59, %v1165_v60  ;;  %1211 = vmatmul.f32.vlgmr.msrb.gmra.mxu3 %v1165_v60 }
 0x9b7   :  { %1479 = vmatpush.msrb.mxu3 %v2502_v10 }
 0x9b8   :  { %v1167_v62 = vand.u32 4294901760, %v1166_v61  ;;  %1241 = vmatmul.f32.vlgmr.msra.gmra.mxu0 %v1166_v61 }
 0x9b9   :  { %1481 = vmatpush.msrb.mxu3 %v2504_v11  ;;  %1508 = vmatpush.msra.mxu0 %v2524_v25 }
 0x9ba   :  { %v1168_v63 = vsub.f32 %v1166_v61, %v1167_v62  ;;  %1268 = vmatmul.f32.vlgmr.msra.gmra.mxu1 %v1167_v62 }
 0x9bb   :  { %1483 = vmatpush.msrb.mxu3 %v2506_v12  ;;  %1539 = vmatpush.msra.mxu1 %v2502_v10 }
 0x9bc   :  { %v1169_v0 = vand.u32 4294901760, %v1168_v63  ;;  %1512 = vmatpush.msra.mxu0 %v2527_v26 }
 0x9bd   :  { %1485 = vmatpush.msrb.mxu3 %v2508_v16  ;;  %1541 = vmatpush.msra.mxu1 %v2504_v11 }
 0x9be   :  { %1170 = vmatmul.f32.vlgmr.msrb.gmra.mxu2 %v1169_v0  ;;  %1326 = vmatmul.f32.vlgmr.msra.gmra.mxu3 %v1165_v60 }
 0x9bf   :  { %1450 = vmatpush.msrb.mxu2 %v2512_v18  ;;  %1543 = vmatpush.msra.mxu1 %v2506_v12 }
 0x9c0   :  { %1516 = vmatpush.msra.mxu0 %v2530_v27  ;;  %1633 = vmatpush.msra.mxu3 %v2542_v37 }
 0x9c1   :  { %1453 = vmatpush.msrb.mxu2 %v2515_v19  ;;  %1545 = vmatpush.msra.mxu1 %v2508_v16 }
 0x9c2   :  { %1520 = vmatpush.msra.mxu0 %v2533_v30  ;;  %1639 = vmatpush.msra.mxu3 %v2544_v39 }
 0x9c3   :  { %1456 = vmatpush.msrb.mxu2 %v2518_v20 }
 0x9c4   :  { %1645 = vmatpush.msra.mxu3 %v2550_v41 }
 0x9c5   :  { %1459 = vmatpush.msrb.mxu2 %v2521_v23 }
 0x9c6   :  { %1301 = vmatmul.f32.vlgmr.msra.gmra.mxu2 %v1165_v60  ;;  %1651 = vmatpush.msra.mxu3 %v2555_v42 }
 0x9c7   :  { %1600 = vmatpush.msra.mxu2 %v2502_v10 }
 0x9c9   :  { %1602 = vmatpush.msra.mxu2 %v2504_v11 }
 0x9cb   :  { %1604 = vmatpush.msra.mxu2 %v2506_v12 }
 0x9cd   :  { %1606 = vmatpush.msra.mxu2 %v2508_v16 }
 0xa35   :  { %v1242_v5 = vpop.f32.mrf.mxu0 }
 0xa37   :  { %v1269_v7 = vpop.f32.mrf.mxu1 }
 0xa39   :  { %v1212_v1 = vpop.f32.mrf.mxu3 }
 0xa41   :  { %v1171_v3 = vpop.f32.mrf.mxu2  ;;  %v1327_v14 = vpop.f32.mrf.mxu3 }
 0xa42   :  { %v1213_v4 = vadd.f32 %v1212_v1, %v1171_v3 }
 0xa44   :  { %v1243_v6 = vadd.f32 %v1242_v5, %v1213_v4 }
 0xa46   :  { %v1270_v8 = vadd.f32 %v1269_v7, %v1243_v6 }
 0xa49   :  { %v1302_v33 = vpop.f32.mrf.mxu2 }
 0xa4a   :  { %v1303_v9 = vadd.f32 %v1302_v33, %v1270_v8 }
 0xa4c   :  { %v1328_v15 = vadd.f32 %v1327_v14, %v1303_v9 }
 0xa4e   :  { %v1331_v17 = vrot.slane %v1328_v15, 4 }
 0xa50   :  { %v1333_v21 = vadd.f32 %v1331_v17, %v2613_v2 }
 0xa52   :  { %v1335_v22 = vmul.f32 0.5, %v1333_v21 }
 0xa54   :  { %2291 = vtanh.f32 %v1335_v22 }
 0xa55   :  { %2293 = vtanh.f32 %v1333_v21 }
 0xa5a   :  { %v2292_v24 = vpop.eup %2291 }
 0xa5b   :  { %v1337_v28 = vmul.f32 0.5, %v2292_v24  ;;  %v2294_v31 = vpop.eup %2293 }
 0xa5d   :  { %v1338_v29 = vadd.f32 0.5, %v1337_v28 }
 0xa5f   :  { %v1339_v32 = vsel %vm2616_vm3, %v2294_v31, %v1338_v29 }
 0xa60   :  { %1345 = vrot.lane.b32.xlu1 %v1339_v32, %s2450_s3  ;;  %v1343_v38 = vmul.f32 %v1341_v36, %v1339_v32 }
 0xad2   :  { %v1346_v34 = vpop.permute.xlu1 %1345 }
 0xad3   :  { %v1348_v35 = vmul.f32 %v1346_v34, %v1339_v32 }
 0xad5   :  { %1350 = vrot.lane.b32.xlu2 %v1348_v35, %s2451_s17 }
 0xb2f   :  { %v1351_v40 = vpop.permute.xlu2 %1350 }
 0xb30   :  { %v2781_v43 = vadd.f32 %v1351_v40, %v1343_v38 }
 0xb32   :  { %2295 = vtanh.f32 %v2781_v43  ;;  %v1562_v9 = vrot.slane %v2781_v43, 7 }
 0xb38   :  { %v2296_v44 = vpop.eup %2295 }
 0xb39   :  { %1356 = vrot.lane.b32.xlu0 %v2296_v44, %s2450_s3 }
 0xbab   :  { %v1357_v45 = vpop.permute.xlu0 %1356 }
 0xbac   :  { %v1359_v46 = vmul.f32 %v1357_v45, %v1339_v32 }
 0xbae   :  { %v1361_v47 = vrot.slane %v1359_v46, 4  ;;  %v2786_v48 = vsel %vm2029_vm8, %v2747_v57, %v1359_v46 }
 0xbb0   :  { %1362 = vrot.lane.b32.xlu1 %v1361_v47, %s2451_s17 }
 0xc22   :  { %v1363_v49 = vpop.permute.xlu1 %1362 }
 0xc23   :  { %v1364_v50 = vsel %vm264_vm4, %v1363_v49, 0 }
 0xc24   :  { %v1386_v51 = vand.u32 4294901760, %v1364_v50 }
 0xc26   :  { %v1387_v52 = vsub.f32 %v1364_v50, %v1386_v51  ;;  %1432 = vmatmul.f32.vlgmr.msrb.gmra.mxu1 %v1386_v51 }
 0xc27   :  { %1700 = vmatpush.msrb.mxu1 %v2502_v10 }
 0xc28   :  { %v1388_v53 = vand.u32 4294901760, %v1387_v52  ;;  %1462 = vmatmul.f32.vlgmr.msrb.gmra.mxu2 %v1387_v52 }
 0xc29   :  { %1702 = vmatpush.msrb.mxu1 %v2504_v11  ;;  %1729 = vmatpush.msrb.mxu2 %v2524_v25 }
 0xc2a   :  { %v1389_v54 = vsub.f32 %v1387_v52, %v1388_v53  ;;  %1489 = vmatmul.f32.vlgmr.msrb.gmra.mxu3 %v1388_v53 }
 0xc2b   :  { %1704 = vmatpush.msrb.mxu1 %v2506_v12  ;;  %1760 = vmatpush.msrb.mxu3 %v2502_v10 }
 0xc2c   :  { %v1390_v55 = vand.u32 4294901760, %v1389_v54  ;;  %1733 = vmatpush.msrb.mxu2 %v2527_v26 }
 0xc2d   :  { %1706 = vmatpush.msrb.mxu1 %v2508_v16  ;;  %1762 = vmatpush.msrb.mxu3 %v2504_v11 }
 0xc2e   :  { %1391 = vmatmul.f32.vlgmr.msrb.gmra.mxu0 %v1390_v55  ;;  %1547 = vmatmul.f32.vlgmr.msra.gmra.mxu1 %v1386_v51 }
 0xc2f   :  { %1671 = vmatpush.msrb.mxu0 %v2512_v18  ;;  %1764 = vmatpush.msrb.mxu3 %v2506_v12 }
 0xc30   :  { %1737 = vmatpush.msrb.mxu2 %v2530_v27  ;;  %1854 = vmatpush.msra.mxu1 %v2542_v37 }
 0xc31   :  { %1674 = vmatpush.msrb.mxu0 %v2515_v19  ;;  %1766 = vmatpush.msrb.mxu3 %v2508_v16 }
 0xc32   :  { %1741 = vmatpush.msrb.mxu2 %v2533_v30  ;;  %1860 = vmatpush.msra.mxu1 %v2544_v39 }
 0xc33   :  { %1677 = vmatpush.msrb.mxu0 %v2518_v20 }
 0xc34   :  { %1866 = vmatpush.msra.mxu1 %v2550_v41 }
 0xc35   :  { %1680 = vmatpush.msrb.mxu0 %v2521_v23 }
 0xc36   :  { %1522 = vmatmul.f32.vlgmr.msra.gmra.mxu0 %v1386_v51  ;;  %1872 = vmatpush.msra.mxu1 %v2555_v42 }
 0xc37   :  { %1821 = vmatpush.msra.mxu0 %v2502_v10 }
 0xc39   :  { %1823 = vmatpush.msra.mxu0 %v2504_v11 }
 0xc3b   :  { %1825 = vmatpush.msra.mxu0 %v2506_v12 }
 0xc3d   :  { %1827 = vmatpush.msra.mxu0 %v2508_v16 }
 0xca3   :  { %v1433_v37 = vpop.f32.mrf.mxu1 }
 0xcab   :  { %v1392_v56 = vpop.f32.mrf.mxu0  ;;  %v1463_v57 = vpop.f32.mrf.mxu2 }
 0xcac   :  { %v1434_v39 = vadd.f32 %v1433_v37, %v1392_v56  ;;  %v1548_v62 = vpop.f32.mrf.mxu1 }
 0xcad   :  { %v1490_v59 = vpop.f32.mrf.mxu3 }
 0xcae   :  { %v1464_v58 = vadd.f32 %v1463_v57, %v1434_v39 }
 0xcb0   :  { %v1491_v41 = vadd.f32 %v1490_v59, %v1464_v58 }
 0xcb3   :  { %v1523_v60 = vpop.f32.mrf.mxu0 }
 0xcb4   :  { %v1524_v61 = vadd.f32 %v1523_v60, %v1491_v41 }
 0xcb6   :  { %v1549_v63 = vadd.f32 %v1548_v62, %v1524_v61 }
 0xcb8   :  { %v1552_v42 = vrot.slane %v1549_v63, 3 }
 0xcba   :  { %v1554_v0 = vadd.f32 %v1552_v42, %v2613_v2 }
 0xcbc   :  { %v1556_v1 = vmul.f32 0.5, %v1554_v0 }
 0xcbe   :  { %2297 = vtanh.f32 %v1556_v1 }
 0xcbf   :  { %2299 = vtanh.f32 %v1554_v0 }
 0xcc4   :  { %v2298_v3 = vpop.eup %2297 }
 0xcc5   :  { %v1558_v4 = vmul.f32 0.5, %v2298_v3  ;;  %v2300_v6 = vpop.eup %2299 }
 0xcc7   :  { %v1559_v5 = vadd.f32 0.5, %v1558_v4 }
 0xcc9   :  { %v1560_v7 = vsel %vm2616_vm3, %v2300_v6, %v1559_v5 }
 0xcca   :  { %1566 = vrot.lane.b32.xlu2 %v1560_v7, %s2450_s3  ;;  %v1564_v14 = vmul.f32 %v1562_v9, %v1560_v7 }
 0xd24   :  { %v1567_v8 = vpop.permute.xlu2 %1566 }
 0xd25   :  { %v1569_v33 = vmul.f32 %v1567_v8, %v1560_v7 }
 0xd27   :  { %1571 = vrot.lane.b32.xlu0 %v1569_v33, %s2451_s17 }
 0xd99   :  { %v1572_v15 = vpop.permute.xlu0 %1571 }
 0xd9a   :  { %v2820_v17 = vadd.f32 %v1572_v15, %v1564_v14 }
 0xd9c   :  { %2301 = vtanh.f32 %v2820_v17  ;;  %v1783_v52 = vrot.slane %v2820_v17, 7 }
 0xda2   :  { %v2302_v21 = vpop.eup %2301 }
 0xda3   :  { %1577 = vrot.lane.b32.xlu1 %v2302_v21, %s2450_s3 }
 0xe15   :  { %v1578_v22 = vpop.permute.xlu1 %1577 }
 0xe16   :  { %v1580_v24 = vmul.f32 %v1578_v22, %v1560_v7 }
 0xe18   :  { %v1582_v28 = vrot.slane %v1580_v24, 5  ;;  %v2825_v29 = vsel %vm2031_vm9, %v2786_v48, %v1580_v24 }
 0xe1a   :  { %1583 = vrot.lane.b32.xlu2 %v1582_v28, %s2451_s17 }
 0xe74   :  { %v1584_v31 = vpop.permute.xlu2 %1583 }
 0xe75   :  { %v1585_v32 = vsel %vm264_vm4, %v1584_v31, 0 }
 0xe76   :  { %v1607_v34 = vand.u32 4294901760, %v1585_v32 }
 0xe78   :  { %v1608_v35 = vsub.f32 %v1585_v32, %v1607_v34  ;;  %1653 = vmatmul.f32.vlgmr.msra.gmra.mxu3 %v1607_v34 }
 0xe79   :  { %1921 = vmatpush.msra.mxu3 %v2502_v10 }
 0xe7a   :  { %v1609_v36 = vand.u32 4294901760, %v1608_v35  ;;  %1683 = vmatmul.f32.vlgmr.msrb.gmra.mxu0 %v1608_v35 }
 0xe7b   :  { %1923 = vmatpush.msra.mxu3 %v2504_v11  ;;  %1950 = vmatpush.msrb.mxu0 %v2524_v25 }
 0xe7c   :  { %v1610_v38 = vsub.f32 %v1608_v35, %v1609_v36  ;;  %1710 = vmatmul.f32.vlgmr.msrb.gmra.mxu1 %v1609_v36 }
 0xe7d   :  { %1925 = vmatpush.msra.mxu3 %v2506_v12  ;;  %1981 = vmatpush.msrb.mxu1 %v2502_v10 }
 0xe7e   :  { %v1611_v40 = vand.u32 4294901760, %v1610_v38  ;;  %1954 = vmatpush.msrb.mxu0 %v2527_v26 }
 0xe7f   :  { %1927 = vmatpush.msra.mxu3 %v2508_v16  ;;  %1983 = vmatpush.msrb.mxu1 %v2504_v11 }
 0xe80   :  { %1612 = vmatmul.f32.vlgmr.msra.gmra.mxu2 %v1611_v40  ;;  %1768 = vmatmul.f32.vlgmr.msrb.gmra.mxu3 %v1607_v34 }
 0xe81   :  { %1892 = vmatpush.msra.mxu2 %v2512_v18  ;;  %1985 = vmatpush.msrb.mxu1 %v2506_v12 }
 0xe82   :  { %1958 = vmatpush.msrb.mxu0 %v2530_v27 }
 0xe83   :  { %1895 = vmatpush.msra.mxu2 %v2515_v19  ;;  %1987 = vmatpush.msrb.mxu1 %v2508_v16 }
 0xe84   :  { %1962 = vmatpush.msrb.mxu0 %v2533_v30 }
 0xe85   :  { %1898 = vmatpush.msra.mxu2 %v2518_v20 }
 0xe87   :  { %1901 = vmatpush.msra.mxu2 %v2521_v23 }
 0xe88   :  { %1743 = vmatmul.f32.vlgmr.msrb.gmra.mxu2 %v1607_v34 }
 0xef7   :  { %v1684_v26 = vpop.f32.mrf.mxu0 }
 0xef9   :  { %v1711_v43 = vpop.f32.mrf.mxu1 }
 0xefb   :  { %v1654_v10 = vpop.f32.mrf.mxu3 }
 0xf03   :  { %v1613_v11 = vpop.f32.mrf.mxu2  ;;  %v1769_v45 = vpop.f32.mrf.mxu3 }
 0xf04   :  { %v1655_v25 = vadd.f32 %v1654_v10, %v1613_v11  ;;  %v2040_v10 = vld [vmem:[#allocation8 + $0x18] sm:$0xff]  ;;  %v2039_v11 = vld [vmem:[#allocation8 + $0x10] sm:$0xff] }
 0xf06   :  { %v1685_v18 = vadd.f32 %v1684_v26, %v1655_v25  ;;  %v2062_v25 = vand.u32 4294901760, %v2040_v10  ;;  %v2064_v26 = vand.u32 4294901760, %v2039_v11 }
 0xf08   :  { %v1712_v12 = vadd.f32 %v1711_v43, %v1685_v18  ;;  %v2092_v13 = vsub.f32 %v2040_v10, %v2062_v25  ;;  %v2098_v18 = vsub.f32 %v2039_v11, %v2064_v26  ;;  %2063 = vmatpush.msrb.mxu2 %v2062_v25 }
 0xf0a   :  { %v2093_v43 = vand.u32 4294901760, %v2092_v13  ;;  %2065 = vmatpush.msrb.mxu2 %v2064_v26 }
 0xf0b   :  { %v1744_v44 = vpop.f32.mrf.mxu2 }
 0xf0c   :  { %v1745_v27 = vadd.f32 %v1744_v44, %v1712_v12  ;;  %v2099_v12 = vand.u32 4294901760, %v2098_v18  ;;  %v2094_v44 = vsub.f32 %v2092_v13, %v2093_v43 }
 0xf0e   :  { %v1770_v19 = vadd.f32 %v1769_v45, %v1745_v27  ;;  %v2100_v27 = vsub.f32 %v2098_v18, %v2099_v12  ;;  %v2095_v45 = vand.u32 4294901760, %v2094_v44 }
 0xf10   :  { %v1773_v46 = vrot.slane %v1770_v19, 2  ;;  %v2101_v19 = vand.u32 4294901760, %v2100_v27  ;;  %2096 = vmatpush.msrb.mxu3 %v2095_v45 }
 0xf12   :  { %v1775_v16 = vadd.f32 %v1773_v46, %v2613_v2  ;;  %2102 = vmatpush.msrb.mxu3 %v2101_v19 }
 0xf14   :  { %v1777_v30 = vmul.f32 0.5, %v1775_v16 }
 0xf16   :  { %2303 = vtanh.f32 %v1777_v30 }
 0xf17   :  { %2305 = vtanh.f32 %v1775_v16 }
 0xf1c   :  { %v2304_v20 = vpop.eup %2303 }
 0xf1d   :  { %v1779_v23 = vmul.f32 0.5, %v2304_v20  ;;  %v2306_v48 = vpop.eup %2305  ;;  %v2038_v20 = vld [vmem:[#allocation8 + $0x8] sm:$0xff] }
 0xf1f   :  { %v1780_v47 = vadd.f32 0.5, %v1779_v23  ;;  %v2066_v23 = vand.u32 4294901760, %v2038_v20 }
 0xf21   :  { %v1781_v49 = vsel %vm2616_vm3, %v2306_v48, %v1780_v47  ;;  %v2037_v47 = vld [vmem:[#allocation8] sm:$0xff]  ;;  %v2104_v48 = vsub.f32 %v2038_v20, %v2066_v23  ;;  %2067 = vmatpush.msrb.mxu2 %v2066_v23 }
 0xf22   :  { %1787 = vrot.lane.b32.xlu0 %v1781_v49, %s2450_s3  ;;  %v1785_v53 = vmul.f32 %v1783_v52, %v1781_v49 }
 0xf94   :  { %v1788_v50 = vpop.permute.xlu0 %1787 }
 0xf95   :  { %v1790_v51 = vmul.f32 %v1788_v50, %v1781_v49  ;;  %v2105_v50 = vand.u32 4294901760, %v2104_v48 }
 0xf97   :  { %1792 = vrot.lane.b32.xlu1 %v1790_v51, %s2451_s17  ;;  %v2106_v52 = vsub.f32 %v2104_v48, %v2105_v50 }
0x1009   :  { %v1793_v54 = vpop.permute.xlu1 %1792 }
0x100a   :  { %v1795_v55 = vadd.f32 %v1793_v54, %v1785_v53  ;;  %v2107_v54 = vand.u32 4294901760, %v2106_v52 }
0x100c   :  { %2307 = vtanh.f32 %v1795_v55  ;;  %v2004_v35 = vrot.slane %v1795_v55, 7  ;;  %2108 = vmatpush.msrb.mxu3 %v2107_v54 }
0x1012   :  { %v2308_v37 = vpop.eup %2307 }
0x1013   :  { %1798 = vrot.lane.b32.xlu2 %v2308_v37, %s2450_s3 }
0x106d   :  { %v1799_v56 = vpop.permute.xlu2 %1798 }
0x106e   :  { %v1801_v39 = vmul.f32 %v1799_v56, %v1781_v49  ;;  %v2068_v49 = vand.u32 4294901760, %v2037_v47 }
0x1070   :  { %v1803_v57 = vrot.slane %v1801_v39, 6  ;;  %v2853_v58 = vsel %vm2033_vm10, %v2825_v29, %v1801_v39  ;;  %v2110_v51 = vsub.f32 %v2037_v47, %v2068_v49  ;;  %2069 = vmatpush.msrb.mxu2 %v2068_v49 }
0x1072   :  { %1804 = vrot.lane.b32.xlu0 %v1803_v57, %s2451_s17  ;;  %v2111_v53 = vand.u32 4294901760, %v2110_v51 }
0x1074   :  { %v2112_v55 = vsub.f32 %v2110_v51, %v2111_v53 }
0x1076   :  { %v2113_v37 = vand.u32 4294901760, %v2112_v55 }
0x1078   :  { %2114 = vmatpush.msrb.mxu3 %v2113_v37 }
0x10e4   :  { %v1805_v59 = vpop.permute.xlu0 %1804 }
0x10e5   :  { %v1806_v41 = vsel %vm264_vm4, %v1805_v59, 0 }
0x10e6   :  { %v1828_v60 = vand.u32 4294901760, %v1806_v41 }
0x10e8   :  { %v1829_v61 = vsub.f32 %v1806_v41, %v1828_v60  ;;  %1874 = vmatmul.f32.vlgmr.msra.gmra.mxu1 %v1828_v60 }
0x10e9   :  { %2163 = vmatpush.msra.mxu1 %v2062_v25 }
0x10ea   :  { %v1830_v62 = vand.u32 4294901760, %v1829_v61  ;;  %1904 = vmatmul.f32.vlgmr.msra.gmra.mxu2 %v1829_v61 }
0x10eb   :  { %2165 = vmatpush.msra.mxu1 %v2064_v26  ;;  %2192 = vmatpush.msra.mxu2 %v2093_v43 }
0x10ec   :  { %v1831_v63 = vsub.f32 %v1829_v61, %v1830_v62  ;;  %1931 = vmatmul.f32.vlgmr.msra.gmra.mxu3 %v1830_v62  ;;  %v2266_v61 = vld [vmem:[%s2877_s5] ss:$0 sm:$0xff] }
0x10ed   :  { %2167 = vmatpush.msra.mxu1 %v2066_v23  ;;  %2196 = vmatpush.msra.mxu2 %v2099_v12 }
0x10ee   :  { %v1832_v42 = vand.u32 4294901760, %v1831_v63  ;;  %2223 = vmatpush.msra.mxu3 %v2062_v25 }
0x10ef   :  { %2169 = vmatpush.msra.mxu1 %v2068_v49  ;;  %2200 = vmatpush.msra.mxu2 %v2105_v50 }
0x10f0   :  { %1833 = vmatmul.f32.vlgmr.msra.gmra.mxu0 %v1832_v42  ;;  %1989 = vmatmul.f32.vlgmr.msrb.gmra.mxu1 %v1828_v60 }
0x10f1   :  { %2134 = vmatpush.msra.mxu0 %v2092_v13  ;;  %2204 = vmatpush.msra.mxu2 %v2111_v53 }
0x10f2   :  { %2225 = vmatpush.msra.mxu3 %v2064_v26 }
0x10f3   :  { %2137 = vmatpush.msra.mxu0 %v2098_v18 }
0x10f4   :  { %2227 = vmatpush.msra.mxu3 %v2066_v23 }
0x10f5   :  { %2140 = vmatpush.msra.mxu0 %v2104_v48 }
0x10f6   :  { %2229 = vmatpush.msra.mxu3 %v2068_v49 }
0x10f7   :  { %2143 = vmatpush.msra.mxu0 %v2110_v51 }
0x10f8   :  { %1964 = vmatmul.f32.vlgmr.msrb.gmra.mxu0 %v1828_v60 }
0x1165   :  { %v1875_v0 = vpop.f32.mrf.mxu1 }
0x116d   :  { %v1834_v1 = vpop.f32.mrf.mxu0  ;;  %v1905_v4 = vpop.f32.mrf.mxu2 }
0x116e   :  { %v1876_v3 = vadd.f32 %v1875_v0, %v1834_v1  ;;  %v1990_v9 = vpop.f32.mrf.mxu1 }
0x116f   :  { %v1932_v6 = vpop.f32.mrf.mxu3 }
0x1170   :  { %v1906_v5 = vadd.f32 %v1905_v4, %v1876_v3 }
0x1172   :  { %v1933_v7 = vadd.f32 %v1932_v6, %v1906_v5 }
0x1175   :  { %v1965_v8 = vpop.f32.mrf.mxu0 }
0x1176   :  { %v1966_v33 = vadd.f32 %v1965_v8, %v1933_v7 }
0x1178   :  { %v1991_v14 = vadd.f32 %v1990_v9, %v1966_v33 }
0x117a   :  { %v1994_v15 = vrot.slane %v1991_v14, 1 }
0x117c   :  { %v1996_v17 = vadd.f32 %v1994_v15, %v2613_v2 }
0x117e   :  { %v1998_v21 = vmul.f32 0.5, %v1996_v17 }
0x1180   :  { %2309 = vtanh.f32 %v1998_v21 }
0x1181   :  { %2311 = vtanh.f32 %v1996_v17 }
0x1186   :  { %v2310_v22 = vpop.eup %2309 }
0x1187   :  { %v2000_v24 = vmul.f32 0.5, %v2310_v22  ;;  %v2312_v29 = vpop.eup %2311 }
0x1189   :  { %v2001_v28 = vadd.f32 0.5, %v2000_v24 }
0x118b   :  { %v2002_v31 = vsel %vm2616_vm3, %v2312_v29, %v2001_v28 }
0x118c   :  { %2008 = vrot.lane.b32.xlu1 %v2002_v31, %s2450_s3  ;;  %v2006_v36 = vmul.f32 %v2004_v35, %v2002_v31 }
0x11fe   :  { %v2009_v32 = vpop.permute.xlu1 %2008 }
0x11ff   :  { %v2011_v34 = vmul.f32 %v2009_v32, %v2002_v31 }
0x1201   :  { %2013 = vrot.lane.b32.xlu2 %v2011_v34, %s2451_s17 }
0x125b   :  { %v2014_v38 = vpop.permute.xlu2 %2013 }
0x125c   :  { %v2016_v2 = vadd.f32 %v2014_v38, %v2006_v36 }
0x125e   :  { %2313 = vtanh.f32 %v2016_v2 }
0x1264   :  { %v2314_v40 = vpop.eup %2313 }
0x1265   :  { %2019 = vrot.lane.b32.xlu0 %v2314_v40, %s2450_s3 }
0x12d7   :  { %v2020_v46 = vpop.permute.xlu0 %2019 }
0x12d8   :  { %v2022_v16 = vmul.f32 %v2020_v46, %v2002_v31 }
0x12da   :  { %v2036_v30 = vsel %vm2035_vm11, %v2853_v58, %v2022_v16 }
0x12db   :  { %2046 = vrot.lane.b32.xlu1 %v2036_v30, %s2451_s17 }
0x134d   :  { %v2047_v56 = vpop.permute.xlu1 %2046 }
0x134e   :  { %v2048_v39 = vsel %vm264_vm4, %v2047_v56, 0 }
0x134f   :  { %v2070_v57 = vand.u32 4294901760, %v2048_v39 }
0x1351   :  { %v2071_v58 = vsub.f32 %v2048_v39, %v2070_v57  ;;  %2116 = vmatmul.f32.vlgmr.msrb.gmra.mxu3 %v2070_v57 }
0x1353   :  { %v2072_v59 = vand.u32 4294901760, %v2071_v58  ;;  %2146 = vmatmul.f32.vlgmr.msra.gmra.mxu0 %v2071_v58 }
0x1355   :  { %v2073_v41 = vsub.f32 %v2071_v58, %v2072_v59  ;;  %2173 = vmatmul.f32.vlgmr.msra.gmra.mxu1 %v2072_v59 }
0x1357   :  { %v2074_v60 = vand.u32 4294901760, %v2073_v41 }
0x1359   :  { %2075 = vmatmul.f32.vlgmr.msrb.gmra.mxu2 %v2074_v60  ;;  %2231 = vmatmul.f32.vlgmr.msra.gmra.mxu3 %v2070_v57 }
0x1361   :  { %2206 = vmatmul.f32.vlgmr.msra.gmra.mxu2 %v2070_v57 }
0x13d0   :  { %v2147_v1 = vpop.f32.mrf.mxu0 }
0x13d2   :  { %v2174_v4 = vpop.f32.mrf.mxu1 }
0x13d4   :  { %v2117_v62 = vpop.f32.mrf.mxu3 }
0x13dc   :  { %v2076_v63 = vpop.f32.mrf.mxu2  ;;  %v2232_v8 = vpop.f32.mrf.mxu3 }
0x13dd   :  { %v2077_v42 = vadd.f32 %v2266_v61, %v2076_v63 }
0x13df   :  { %v2118_v0 = vadd.f32 %v2117_v62, %v2077_v42 }
0x13e1   :  { %v2148_v3 = vadd.f32 %v2147_v1, %v2118_v0 }
0x13e3   :  { %v2175_v5 = vadd.f32 %v2174_v4, %v2148_v3 }
0x13e4   :  { %v2207_v6 = vpop.f32.mrf.mxu2 }
0x13e5   :  { %v2208_v7 = vadd.f32 %v2207_v6, %v2175_v5 }
0x13e7   :  { %v2233_v33 = vadd.f32 %v2232_v8, %v2208_v7 }
0x13e9   :  { %2235 = vst [vmem:[#allocation10] sm:$0xff] %v2233_v33 }
0x13ea   :  { %2246 = dma.vmem_to_hbm [thread:$0]  %s2242_s21, 128, %s2244_s24, [#allocation4]  }
0x13eb   :  { %2441 = dma.done.wait [#allocation4], 128  }
0x13ec   :  { %2442 = vsyncadd [#allocation4], 4294967168 }
0x13ed   :  { %2251 = vsyncpa [#allocation3], 1 }
0x13ee   :  { %2252 = vsyncpa [#allocation6], 1 }
0x13ef   :  { %2253 = vsyncpa [#allocation9], 1 }
0x13f0   :  { %2254 = vsyncpa [#allocation4], 1 }

</bundles_post_ra>
